<compile_context>
chip_gen: v7x
topology: tpu7x:2x2x1
jax: 0.10.0
libtpu: 0.0.40
codegen_flags: <defaults>
</compile_context>

<pallas_src>
import functools

import jax
import jax.numpy as jnp
import numpy as np
from jax.experimental import pallas as pl
from jax.experimental.pallas import tpu as pltpu


# -----------------------------------------------------------------------------
# Fused kernel: one grid step handles block_b batch rows end-to-end.
# -----------------------------------------------------------------------------
def soft_attention_kernel(si_ref, ctx_ref, w1_ref, w2_ref, v_ref,
                          woc_ref, wos_ref, comb_ref):
    si = si_ref[...]                        # (Bb, D)   (bf16 or f32)
    ctx = ctx_ref[...]                      # (Bb, L, D)
    Bb, L, D = ctx.shape
    H = w1_ref.shape[1]

    # ---- feedforward scores: e[b,l] = v . tanh(W1 si_b + W2 h_bl) (f32 acc) ----
    si_p = jnp.dot(si, w1_ref[...], preferred_element_type=jnp.float32)       # (Bb, H)
    h_p = jnp.dot(ctx.reshape(Bb * L, D), w2_ref[...],
                  preferred_element_type=jnp.float32).reshape(Bb, L, H)       # (Bb, L, H)
    g = jnp.tanh(h_p + si_p[:, None, :])                                      # f32
    v = v_ref[...].astype(jnp.float32).reshape(1, 1, H)
    scores = jnp.sum(g * v, axis=-1)                                          # (Bb, L) lane-major

    # ---- softmax over L on the lane axis, all f32, EXACT reciprocal ----
    m = jnp.max(scores, axis=-1, keepdims=True)                               # (Bb, 1)
    p = jnp.exp(scores - m)                                                   # (Bb, L)
    denom = jnp.sum(p, axis=-1, keepdims=True)                                # (Bb, 1)
    attn = p / denom                                                          # (Bb, L)

    # ---- context vector: VPU broadcast-multiply + sublane reduce (no M=1 matmuls) ----
    ci = jnp.sum(attn[:, :, None] * ctx.astype(jnp.float32), axis=1)          # (Bb, D)

    # ---- output: tanh(W_out [ci ; si]) as two matmuls (no lane concat of inputs) ----
    out = jnp.tanh(
        jnp.dot(ci.astype(si.dtype), woc_ref[...], preferred_element_type=jnp.float32)
        + jnp.dot(si, wos_ref[...], preferred_element_type=jnp.float32))      # (Bb, D)

    # single lane-dense store: [si_tilde ; attn] -> (Bb, D + L)
    comb_ref[...] = jnp.concatenate([out, attn], axis=-1).astype(comb_ref.dtype)


# -----------------------------------------------------------------------------
# Wrapper: batched grid over B, resident weights, bf16 HBM stream, fused output.
# -----------------------------------------------------------------------------
@functools.partial(jax.jit, static_argnames=("block_b", "use_bf16"))
def soft_attention(si, ctx, w1, w2, v, wo_c, wo_s, *, block_b=16, use_bf16=True):
    """si: (B, D), ctx: (B, L, D).  Returns (si_tilde (B, D), attn (B, L))."""
    B, L, D = ctx.shape
    H = w1.shape[1]
    assert block_b % 8 == 0, "block_b must be a multiple of 8 (sublane tiling)"

    # Pad B up to a multiple of block_b; padded rows are all-zero and compute a
    # harmless uniform softmax (no NaNs), then get sliced away.
    n_blocks = pl.cdiv(B, block_b)
    Bp = n_blocks * block_b
    if Bp != B:
        si = jnp.pad(si, ((0, Bp - B), (0, 0)))
        ctx = jnp.pad(ctx, ((0, Bp - B), (0, 0), (0, 0)))

    # bf16 HBM stream + bf16 MXU operands; f32 accumulation / softmax in-kernel.
    op_dtype = jnp.bfloat16 if use_bf16 else jnp.float32
    si_c = si.astype(op_dtype)
    ctx_c = ctx.astype(op_dtype)
    w1_c, w2_c = w1.astype(op_dtype), w2.astype(op_dtype)
    woc_c, wos_c = wo_c.astype(op_dtype), wo_s.astype(op_dtype)
    v_c = v.astype(jnp.float32)  # tiny; used only on the VPU

    # VMEM budget (double-buffered streams + resident weights + f32 intermediates),
    # with margin; floored at the 32 MiB scoped default and capped below v7x's 64 MiB.
    itemsize = 2 if use_bf16 else 4
    stream_bytes = block_b * (L * D + D) * itemsize
    weight_bytes = (2 * D * H + 2 * D * D) * itemsize + H * 4
    out_bytes = block_b * (D + L) * 4
    interm_bytes = 4 * block_b * L * H * 4
    vmem_needed = 2 * (stream_bytes + out_bytes) + weight_bytes + interm_bytes
    vmem_limit = int(min(max(4 * vmem_needed, 32 * 1024 * 1024), 48 * 1024 * 1024))

    comb = pl.pallas_call(
        soft_attention_kernel,
        out_shape=jax.ShapeDtypeStruct((Bp, D + L), jnp.float32),
        grid=(n_blocks,),
        in_specs=[
            pl.BlockSpec((block_b, D), lambda i: (i, 0)),        # si
            pl.BlockSpec((block_b, L, D), lambda i: (i, 0, 0)),  # context
            pl.BlockSpec((D, H), lambda i: (0, 0)),              # W1  (resident)
            pl.BlockSpec((D, H), lambda i: (0, 0)),              # W2  (resident)
            pl.BlockSpec((1, H), lambda i: (0, 0)),              # v   (resident)
            pl.BlockSpec((D, D), lambda i: (0, 0)),              # W_out (ci half)
            pl.BlockSpec((D, D), lambda i: (0, 0)),              # W_out (si half)
        ],
        out_specs=pl.BlockSpec((block_b, D + L), lambda i: (i, 0)),
        compiler_params=pltpu.CompilerParams(
            dimension_semantics=("parallel",),
            vmem_limit_bytes=vmem_limit),
    )(si_c, ctx_c, w1_c, w2_c, v_c, woc_c, wos_c)

    return comb[:B, :D], comb[:B, D:]


# -----------------------------------------------------------------------------
# Pure-JAX f32 reference (same math, same weight layout) for verification.
# Weight layout: w* are transposes of the PyTorch nn.Linear weights;
# wo_c/wo_s are the [:D] / [D:] row-halves of linear_out.weight.T.
# -----------------------------------------------------------------------------
def reference_forward(si, ctx, w1, w2, v, wo_c, wo_s):
    hp = jax.lax.Precision.HIGHEST
    B, L, D = ctx.shape
    si_p = jnp.dot(si, w1, precision=hp)                              # (B, H)
    h_p = jnp.dot(ctx.reshape(B * L, D), w2, precision=hp).reshape(B, L, -1)
    g = jnp.tanh(h_p + si_p[:, None, :])
    scores = jnp.einsum('blh,h->bl', g, v[0], precision=hp)           # (B, L)
    attn = jax.nn.softmax(scores, axis=-1)
    ci = jnp.einsum('bl,bld->bd', attn, ctx, precision=hp)            # (B, D)
    out = jnp.tanh(jnp.dot(ci, wo_c, precision=hp) + jnp.dot(si, wo_s, precision=hp))
    return out, attn


if __name__ == "__main__":
    key = jax.random.PRNGKey(0)
    ks = jax.random.split(key, 7)

    # small shapes consistent with the module: batch=16, sourceL=16, input_size=32
    B, L, D = 16, 16, 32
    H = D  # hidden_size defaults to input_size

    si = jax.random.normal(ks[0], (B, D), jnp.float32)         # decoder state
    ctx = jax.random.normal(ks[1], (B, L, D), jnp.float32)     # encoder states
    sc = 0.1
    w1 = sc * jax.random.normal(ks[2], (D, H), jnp.float32)    # linear_W1.weight.T
    w2 = sc * jax.random.normal(ks[3], (D, H), jnp.float32)    # linear_W2.weight.T
    v = sc * jax.random.normal(ks[4], (1, H), jnp.float32)     # linear_v.weight
    wo_c = sc * jax.random.normal(ks[5], (D, D), jnp.float32)  # linear_out.weight.T[:D]
    wo_s = sc * jax.random.normal(ks[6], (D, D), jnp.float32)  # linear_out.weight.T[D:]

    si_tilde, attn = soft_attention(si, ctx, w1, w2, v, wo_c, wo_s,
                                    block_b=16, use_bf16=True)
    si_tilde = jax.block_until_ready(si_tilde)
    attn = jax.block_until_ready(attn)

    ref_out, ref_attn = reference_forward(si, ctx, w1, w2, v, wo_c, wo_s)

    assert si_tilde.shape == (B, D) and attn.shape == (B, L)
    # softmax is f32 with an exact divide -> rows sum to 1
    np.testing.assert_allclose(np.asarray(attn).sum(-1), np.ones(B),
                               rtol=0, atol=1e-5)
    # bf16 MXU operands (f32 accumulate, f32 softmax/tanh) vs the f32 reference
    np.testing.assert_allclose(np.asarray(attn), np.asarray(ref_attn),
                               rtol=2e-2, atol=5e-3)
    np.testing.assert_allclose(np.asarray(si_tilde), np.asarray(ref_out),
                               rtol=3e-2, atol=1e-2)

    print("KERNEL_OK")
</pallas_src>

<mosaic_0001>
module attributes {stable_mosaic.version = 11 : i64} {
  func.func @soft_attention_kernel(%arg0: i32, %arg1: memref<16x32xbf16, #tpu.memory_space<vmem>>, %arg2: memref<16x16x32xbf16, #tpu.memory_space<vmem>>, %arg3: memref<32x32xbf16, #tpu.memory_space<vmem>>, %arg4: memref<32x32xbf16, #tpu.memory_space<vmem>>, %arg5: memref<1x32xf32, #tpu.memory_space<vmem>>, %arg6: memref<32x32xbf16, #tpu.memory_space<vmem>>, %arg7: memref<32x32xbf16, #tpu.memory_space<vmem>>, %arg8: memref<16x48xf32, #tpu.memory_space<vmem>>) attributes {dimension_semantics = [#tpu.dimension_semantics<parallel>], iteration_bounds = array<i64: 1>, scalar_prefetch = 0 : i64, scratch_operands = 0 : i64, tpu.core_type = #tpu.core_type<tc>, window_params = [{transform_indices = @transform_0, window_bounds = array<i64: 16, 32>}, {transform_indices = @transform_1, window_bounds = array<i64: 16, 16, 32>}, {pipeline_mode = #tpu.pipeline_mode<synchronous>, transform_indices = @transform_2, window_bounds = array<i64: 32, 32>}, {pipeline_mode = #tpu.pipeline_mode<synchronous>, transform_indices = @transform_3, window_bounds = array<i64: 32, 32>}, {pipeline_mode = #tpu.pipeline_mode<synchronous>, transform_indices = @transform_4, window_bounds = array<i64: 1, 32>}, {pipeline_mode = #tpu.pipeline_mode<synchronous>, transform_indices = @transform_5, window_bounds = array<i64: 32, 32>}, {pipeline_mode = #tpu.pipeline_mode<synchronous>, transform_indices = @transform_6, window_bounds = array<i64: 32, 32>}, {transform_indices = @transform_7, window_bounds = array<i64: 16, 48>}]} {
    %c0 = arith.constant 0 : index
    %c0_0 = arith.constant 0 : index
    %0 = vector.load %arg1[%c0, %c0_0] : memref<16x32xbf16, #tpu.memory_space<vmem>>, vector<16x32xbf16>
    %c0_1 = arith.constant 0 : index
    %c0_2 = arith.constant 0 : index
    %c0_3 = arith.constant 0 : index
    %1 = vector.load %arg2[%c0_1, %c0_2, %c0_3] : memref<16x16x32xbf16, #tpu.memory_space<vmem>>, vector<16x16x32xbf16>
    %c0_4 = arith.constant 0 : index
    %c0_5 = arith.constant 0 : index
    %2 = vector.load %arg3[%c0_4, %c0_5] : memref<32x32xbf16, #tpu.memory_space<vmem>>, vector<32x32xbf16>
    %cst = arith.constant dense<0.000000e+00> : vector<16x32xf32>
    %3 = tpu.matmul %0, %2, %cst {dimension_numbers = #tpu.dot_dimension_numbers<[1], [0], [0], [1], [0, 0, 1, 1], [], []>} : vector<16x32xbf16>, vector<32x32xbf16>, vector<16x32xf32> -> vector<16x32xf32>
    %4 = vector.shape_cast %1 : vector<16x16x32xbf16> to vector<256x32xbf16>
    %c0_6 = arith.constant 0 : index
    %c0_7 = arith.constant 0 : index
    %5 = vector.load %arg4[%c0_6, %c0_7] : memref<32x32xbf16, #tpu.memory_space<vmem>>, vector<32x32xbf16>
    %cst_8 = arith.constant dense<0.000000e+00> : vector<256x32xf32>
    %6 = tpu.matmul %4, %5, %cst_8 {dimension_numbers = #tpu.dot_dimension_numbers<[1], [0], [0], [1], [0, 0, 1, 1], [], []>} : vector<256x32xbf16>, vector<32x32xbf16>, vector<256x32xf32> -> vector<256x32xf32>
    %7 = vector.shape_cast %6 : vector<256x32xf32> to vector<16x16x32xf32>
    %8 = vector.shape_cast %3 : vector<16x32xf32> to vector<16x1x32xf32>
    %9 = vector.broadcast %8 : vector<16x1x32xf32> to vector<16x16x32xf32>
    %10 = arith.addf %7, %9 : vector<16x16x32xf32>
    %11 = math.tanh %10 : vector<16x16x32xf32>
    %c0_9 = arith.constant 0 : index
    %c0_10 = arith.constant 0 : index
    %12 = vector.load %arg5[%c0_9, %c0_10] : memref<1x32xf32, #tpu.memory_space<vmem>>, vector<1x32xf32>
    %13 = vector.shape_cast %12 : vector<1x32xf32> to vector<1x1x32xf32>
    %14 = vector.broadcast %13 : vector<1x1x32xf32> to vector<16x16x32xf32>
    %15 = arith.mulf %11, %14 : vector<16x16x32xf32>
    %cst_11 = arith.constant dense<0.000000e+00> : vector<16x16xf32>
    %16 = vector.multi_reduction <add>, %15, %cst_11 [2] : vector<16x16x32xf32> to vector<16x16xf32>
    %cst_12 = arith.constant dense<0xFF800000> : vector<16xf32>
    %17 = vector.multi_reduction <maximumf>, %16, %cst_12 [1] : vector<16x16xf32> to vector<16xf32>
    %18 = vector.shape_cast %17 : vector<16xf32> to vector<16x1xf32>
    %19 = vector.broadcast %18 : vector<16x1xf32> to vector<16x16xf32>
    %20 = arith.subf %16, %19 : vector<16x16xf32>
    %21 = math.exp %20 : vector<16x16xf32>
    %cst_13 = arith.constant dense<0.000000e+00> : vector<16xf32>
    %22 = vector.multi_reduction <add>, %21, %cst_13 [1] : vector<16x16xf32> to vector<16xf32>
    %23 = vector.shape_cast %22 : vector<16xf32> to vector<16x1xf32>
    %24 = vector.broadcast %23 : vector<16x1xf32> to vector<16x16xf32>
    %25 = arith.divf %21, %24 : vector<16x16xf32>
    %26 = vector.shape_cast %25 : vector<16x16xf32> to vector<16x16x1xf32>
    %27 = arith.extf %1 : vector<16x16x32xbf16> to vector<16x16x32xf32>
    %28 = vector.broadcast %26 : vector<16x16x1xf32> to vector<16x16x32xf32>
    %29 = arith.mulf %28, %27 : vector<16x16x32xf32>
    %cst_14 = arith.constant dense<0.000000e+00> : vector<16x32xf32>
    %30 = vector.multi_reduction <add>, %29, %cst_14 [1] : vector<16x16x32xf32> to vector<16x32xf32>
    %31 = arith.truncf %30 : vector<16x32xf32> to vector<16x32xbf16>
    %c0_15 = arith.constant 0 : index
    %c0_16 = arith.constant 0 : index
    %32 = vector.load %arg6[%c0_15, %c0_16] : memref<32x32xbf16, #tpu.memory_space<vmem>>, vector<32x32xbf16>
    %cst_17 = arith.constant dense<0.000000e+00> : vector<16x32xf32>
    %33 = tpu.matmul %31, %32, %cst_17 {dimension_numbers = #tpu.dot_dimension_numbers<[1], [0], [0], [1], [0, 0, 1, 1], [], []>} : vector<16x32xbf16>, vector<32x32xbf16>, vector<16x32xf32> -> vector<16x32xf32>
    %c0_18 = arith.constant 0 : index
    %c0_19 = arith.constant 0 : index
    %34 = vector.load %arg7[%c0_18, %c0_19] : memref<32x32xbf16, #tpu.memory_space<vmem>>, vector<32x32xbf16>
    %cst_20 = arith.constant dense<0.000000e+00> : vector<16x32xf32>
    %35 = tpu.matmul %0, %34, %cst_20 {dimension_numbers = #tpu.dot_dimension_numbers<[1], [0], [0], [1], [0, 0, 1, 1], [], []>} : vector<16x32xbf16>, vector<32x32xbf16>, vector<16x32xf32> -> vector<16x32xf32>
    %36 = arith.addf %33, %35 : vector<16x32xf32>
    %37 = math.tanh %36 : vector<16x32xf32>
    %38 = tpu.concatenate %37, %25 in 1 : vector<16x32xf32>, vector<16x16xf32> -> vector<16x48xf32>
    %c0_21 = arith.constant 0 : index
    %c0_22 = arith.constant 0 : index
    %39 = vector.load %arg8[%c0_21, %c0_22] : memref<16x48xf32, #tpu.memory_space<vmem>>, vector<16x48xf32>
    tpu.vector_store %arg8[%c0_21, %c0_22], %38 {strides = array<i32>} : memref<16x48xf32, #tpu.memory_space<vmem>>, vector<16x48xf32>,
    return
  }
  func.func @transform_0(%arg0: i32) -> (i32, i32) {
    %c0_i32 = arith.constant 0 : i32
    %c0_i32_0 = arith.constant 0 : i32
    return %arg0, %c0_i32 : i32, i32
  }
  func.func @transform_1(%arg0: i32) -> (i32, i32, i32) {
    %c0_i32 = arith.constant 0 : i32
    %c0_i32_0 = arith.constant 0 : i32
    %c0_i32_1 = arith.constant 0 : i32
    return %arg0, %c0_i32, %c0_i32_0 : i32, i32, i32
  }
  func.func @transform_2(%arg0: i32) -> (i32, i32) {
    %c0_i32 = arith.constant 0 : i32
    %c0_i32_0 = arith.constant 0 : i32
    %c0_i32_1 = arith.constant 0 : i32
    return %c0_i32, %c0_i32_0 : i32, i32
  }
  func.func @transform_3(%arg0: i32) -> (i32, i32) {
    %c0_i32 = arith.constant 0 : i32
    %c0_i32_0 = arith.constant 0 : i32
    %c0_i32_1 = arith.constant 0 : i32
    return %c0_i32, %c0_i32_0 : i32, i32
  }
  func.func @transform_4(%arg0: i32) -> (i32, i32) {
    %c0_i32 = arith.constant 0 : i32
    %c0_i32_0 = arith.constant 0 : i32
    %c0_i32_1 = arith.constant 0 : i32
    return %c0_i32, %c0_i32_0 : i32, i32
  }
  func.func @transform_5(%arg0: i32) -> (i32, i32) {
    %c0_i32 = arith.constant 0 : i32
    %c0_i32_0 = arith.constant 0 : i32
    %c0_i32_1 = arith.constant 0 : i32
    return %c0_i32, %c0_i32_0 : i32, i32
  }
  func.func @transform_6(%arg0: i32) -> (i32, i32) {
    %c0_i32 = arith.constant 0 : i32
    %c0_i32_0 = arith.constant 0 : i32
    %c0_i32_1 = arith.constant 0 : i32
    return %c0_i32, %c0_i32_0 : i32, i32
  }
  func.func @transform_7(%arg0: i32) -> (i32, i32) {
    %c0_i32 = arith.constant 0 : i32
    %c0_i32_0 = arith.constant 0 : i32
    return %arg0, %c0_i32 : i32, i32
  }
}

</mosaic_0001>

<bundles_post_ra>
// kernel: soft_attention.1
= control target key start
LH: loop header
LB: loop body
LE: loop exit
PB: predicated region body
PF: predicated region fallthrough
CT: control target
= control target key end

     0   :  { %v3791_v0 = vmov 0.0   ;;  %vm2714_vm0 = vmmov 0   ;;  %vm82_vm1 = vcmask 261120   ;;  %v2715_v22 = vmov 1966171168   ;;  %s3783_s2 = inlined_call_operand.vmem [shape: bf16[32,32], index: 2, kind: input, shape index: {}]   ;;  %s3784_s3 = inlined_call_operand.vmem [shape: bf16[32,32], index: 3, kind: input, shape index: {}]   ;;  %s3785_s0 = inlined_call_operand.vmem [shape: bf16[16,32], index: 0, kind: input, shape index: {}]   ;;  %s3786_s1 = inlined_call_operand.vmem [shape: bf16[16,16,32], index: 1, kind: input, shape index: {}]   ;;  %s3787_s4 = inlined_call_operand.vmem [shape: f32[1,32], index: 4, kind: input, shape index: {}]   ;;  %s3788_s6 = inlined_call_operand.vmem [shape: bf16[32,32], index: 6, kind: input, shape index: {}]   ;;  %s3789_s5 = inlined_call_operand.vmem [shape: bf16[32,32], index: 5, kind: input, shape index: {}]   ;;  %s3790_s7 = inlined_call_operand.vmem [shape: f32[16,48], index: 7, kind: output, shape index: {}]  }
   0x1   :  { %2417 = vmatprep.subr.bf16.mxu0 %v3791_v0  ;;  %v2491_v1 = vld [vmem:[%s3783_s2] sm:$0xff]   ;;  %2421 = vmatprep.mubr.msk.bf16.mxu0 %vm2714_vm0, %v3791_v0  ;;  %v2493_v3 = vld [vmem:[%s3783_s2 + $0x8] sm:$0xff]   ;;  %v41_v9 = vld [vmem:[%s3786_s1 + $0x30] sm:$0xff]   ;;  %v436_v23 = vunpack.c.l.s4 %v2715_v22  ;;  %v438_v24 = vlaneseq  ;;  %vm854_vm2 = vcmask 130112   ;;  %vm991_vm3 = vcmask 1041409  }
   0x2   :  { %v2492_v2 = vld [vmem:[%s3784_s3] sm:$0xff]   ;;  %2418 = vmatpush3.bf16.msra.mxu0 %v2491_v1  ;;  %v2494_v4 = vld [vmem:[%s3784_s3 + $0x8] sm:$0xff]   ;;  %v33_v11 = vld [vmem:[%s3786_s1 + $0x10] sm:$0xff]   ;;  %vm993_vm4 = vcmask 1042434   ;;  %vm995_vm5 = vcmask 1043459   ;;  %vm997_vm6 = vcmask 1044484  }
   0x3   :  { %2477 = vmatprep.subr.bf16.mxu1 %v2492_v2  ;;  %2419 = vmatprep.subr.bf16.mxu0 %v3791_v0  ;;  %v2495_v5 = vld [vmem:[%s3785_s0] sm:$0xff]   ;;  %v39_v7 = vld [vmem:[%s3786_s1 + $0x28] sm:$0xff]   ;;  %v43_v12 = vld [vmem:[%s3786_s1 + $0x38] sm:$0xff]   ;;  %v437_v25 = vunpack.c.0.s8 %v436_v23  ;;  %v2845_v26 = vshrl.u32 %v438_v24, 7  ;;  %vm999_vm7 = vcmask 1045509   ;;  %vm1001_vm8 = vcmask 1046534  }
   0x4   :  { %2479 = vmatpush3.bf16.msra.mxu1 %v2492_v2  ;;  %v37_v6 = vld [vmem:[%s3786_s1 + $0x20] sm:$0xff]   ;;  %v31_v10 = vld [vmem:[%s3786_s1 + $0x8] sm:$0xff]   ;;  %v35_v14 = vld [vmem:[%s3786_s1 + $0x18] sm:$0xff]   ;;  %vm1003_vm9 = vcmask 1047559   ;;  %vm1014_vm10 = vcmask 130048   ;;  %vm2183_vm11 = vcmask 392512  }
   0x5   :  { %2478 = vmatprep.subr.bf16.mxu1 %v2494_v4  ;;  %v29_v8 = vld [vmem:[%s3786_s1] sm:$0xff]   ;;  %2437 = vmatprep.mubr.msk.bf16.mxu1 %vm82_vm1, %v37_v6  ;;  %v47_v15 = vld [vmem:[%s3786_s1 + $0x48] sm:$0xff]   ;;  %v49_v16 = vld [vmem:[%s3786_s1 + $0x50] sm:$0xff]   ;;  %3799 = vst [vmem:[#allocation2_spill] sm:$0xff] %v2845_v26  ;;  %v2848_v27 = vsub.s32 %v437_v25, %v2845_v26  ;;  %v2858_v40 = vsub.s32 0, %v2845_v26  ;;  %vm2338_vm12 = vcmask 392192  }
   0x6   :  { %2420 = vmatpush3.bf16.msra.mxu0 %v2493_v3  ;;  %v45_v13 = vld [vmem:[%s3786_s1 + $0x40] sm:$0xff]   ;;  %v51_v17 = vld [vmem:[%s3786_s1 + $0x58] sm:$0xff]   ;;  %v55_v19 = vld [vmem:[%s3786_s1 + $0x68] sm:$0xff]  }
   0x7   :  { %2425 = vmatprep.subr.bf16.mxu0 %v2492_v2  ;;  %v53_v18 = vld [vmem:[%s3786_s1 + $0x60] sm:$0xff]   ;;  %v57_v20 = vld [vmem:[%s3786_s1 + $0x70] sm:$0xff]   ;;  %v59_v21 = vld [vmem:[%s3786_s1 + $0x78] sm:$0xff]  }
   0x8   :  { %2480 = vmatpush3.bf16.msra.mxu1 %v2494_v4 }
   0x9   :  { %2422 = vmatmul.mubr.msk.bf16.vlgmr.msra.gmra.mrb[0].mxu0 %vm82_vm1, %v2495_v5 }
   0xa   :  { %2426 = vmatpush3.bf16.msra.mxu0 %v2492_v2  ;;  %2429 = vmatprep.mubr.msk.bf16.mxu0 %vm82_vm1, %v29_v8 }
   0xb   :  { %2438 = vmatmul.mubr.msk.bf16.vlgmr.msra.gmra.mrb[0].mxu1 %vm82_vm1, %v39_v7  ;;  %2427 = vmatprep.subr.bf16.mxu0 %v2494_v4 }
   0xc   :  { %2441 = vmatprep.mubr.msk.bf16.mxu1 %vm82_vm1, %v41_v9 }
   0xe   :  { %2428 = vmatpush3.bf16.msra.mxu0 %v2494_v4 }
   0xf   :  { %2461 = vmatprep.subr.bf16.mxu0 %v3791_v0 }
  0x11   :  { %2430 = vmatmul.mubr.msk.bf16.vlgmr.msra.gmra.mrb[4].mxu0 %vm82_vm1, %v31_v10 }
  0x12   :  { %2433 = vmatprep.mubr.msk.bf16.mxu0 %vm82_vm1, %v33_v11 }
  0x13   :  { %2442 = vmatmul.mubr.msk.bf16.gmra.mrb[4].mxu1 %vm82_vm1, %v43_v12 }
  0x14   :  { %2445 = vmatprep.mubr.msk.bf16.mxu1 %vm82_vm1, %v45_v13 }
  0x19   :  { %2434 = vmatmul.mubr.msk.bf16.gmra.mrb[8].mxu0 %vm82_vm1, %v35_v14 }
  0x1a   :  { %2465 = vmatprep.mubr.msk.bf16.mxu0 %vm2714_vm0, %v3791_v0 }
  0x1b   :  { %2446 = vmatmul.mubr.msk.bf16.gmra.mrb[8].mxu1 %vm82_vm1, %v47_v15 }
  0x1c   :  { %2449 = vmatprep.mubr.msk.bf16.mxu1 %vm82_vm1, %v49_v16 }
  0x23   :  { %2450 = vmatmul.mubr.msk.bf16.gmra.mrb[12].mxu1 %vm82_vm1, %v51_v17 }
  0x24   :  { %2453 = vmatprep.mubr.msk.bf16.mxu1 %vm82_vm1, %v53_v18 }
  0x2b   :  { %2454 = vmatmul.mubr.msk.bf16.gmra.mrb[16].mxu1 %vm82_vm1, %v55_v19 }
  0x2c   :  { %2457 = vmatprep.mubr.msk.bf16.mxu1 %vm82_vm1, %v57_v20 }
  0x33   :  { %2458 = vmatmul.mubr.msk.bf16.gmra.mrb[20].mxu1 %vm82_vm1, %v59_v21 }
  0xdc   :  { %v120_v28 = vpop.f32.mrb[0].mxu0 }
  0xdd   :  { %v434_v29 = vcombine.high %v120_v28, %v120_v28  ;;  %v441_v30 = vrot.slane %v120_v28, %v2848_v27  ;;  %v2423_v31 = vpop.f32.mrb[1].mxu0 }
  0xde   :  { %v2851_v32 = vpop.f32.mrb[2].mxu0  ;;  %v2439_v33 = vpop.f32.mrb[0].mxu1 }
  0xdf   :  { %v448_v34 = vrot.slane %v434_v29, %v2848_v27  ;;  %v449_v35 = vcombine.high %v441_v30, %v441_v30  ;;  %v2424_v36 = vpop.f32.mrb[3].mxu0  ;;  %v337_v37 = vpop.f32.mrb[1].mxu1  ;;  %v457_v38 = vrot.slane %v441_v30, %v2848_v27  ;;  %v490_v39 = vrot.slane %v2851_v32, %v2848_v27 }
  0xe0   :  { %v2440_v41 = vpop.f32.mrb[2].mxu1  ;;  %v483_v18 = vcombine.high %v2851_v32, %v2851_v32 }
  0xe1   :  { %v450_v42 = vcombine.high %v448_v34, %v448_v34  ;;  %v464_v43 = vrot.slane %v448_v34, %v2848_v27  ;;  %v471_v44 = vrot.slane %v449_v35, %v2848_v27  ;;  %v340_v45 = vpop.f32.mrb[3].mxu1  ;;  %v498_v49 = vcombine.high %v490_v39, %v490_v39  ;;  %v2886_v35 = vld [vmem:[%s3787_s4] ss:$0 sm:$0xff] }
  0xe2   :  { %v535_v51 = vrot.slane %v457_v38, %v2858_v40  ;;  %v479_v53 = vcombine.high %v457_v38, %v457_v38  ;;  %v506_v11 = vrot.slane %v490_v39, %v2848_v27  ;;  %v497_v36 = vrot.slane %v483_v18, %v2848_v27 }
  0xe3   :  { %v478_v46 = vrot.slane %v450_v42, %v2848_v27  ;;  %v551_v47 = vrot.slane %v464_v43, %v2858_v40  ;;  %v539_v48 = vrot.slane %v471_v44, %v2858_v40  ;;  %v480_v52 = vcombine.high %v464_v43, %v464_v43 }
  0xe4   :  { %v2431_v50 = vpop.f32.mrb[4].mxu0  ;;  %v481_v1 = vcombine.high %v471_v44, %v471_v44  ;;  %v520_v13 = vrot.slane %v498_v49, %v2848_v27  ;;  %v543_v20 = vrot.slane %v479_v53, %v2858_v40  ;;  %v567_v30 = vrot.slane %v506_v11, %v2858_v40 }
  0xe5   :  { %v555_v54 = vrot.slane %v478_v46, %v2858_v40  ;;  %v620_v55 = vadd.f32 %v551_v47, %v337_v37  ;;  %v614_v56 = vadd.f32 %v2431_v50, %v539_v48  ;;  %v621_v57 = vadd.f32 %v551_v47, %v340_v45  ;;  %v305_v58 = vpop.f32.mrb[5].mxu0 }
  0xe6   :  { %v612_v59 = vadd.f32 %v535_v51, %v305_v58  ;;  %v2443_v60 = vpop.f32.mrb[4].mxu1  ;;  %v482_v61 = vcombine.high %v478_v46, %v478_v46  ;;  %v2432_v62 = vpop.f32.mrb[6].mxu0  ;;  %v559_v63 = vrot.slane %v480_v52, %v2858_v40  ;;  %v547_v17 = vrot.slane %v481_v1, %v2858_v40 }
  0xe7   :  { %v622_v2 = vadd.f32 %v2439_v33, %v555_v54  ;;  %2532 = vtanh.f32 %v620_v55  ;;  %v623_v3 = vadd.f32 %v2440_v41, %v555_v54  ;;  %v615_v4 = vadd.f32 %v2432_v62, %v539_v48  ;;  %v353_v5 = vpop.f32.mrb[5].mxu1  ;;  %v308_v6 = vpop.f32.mrb[7].mxu0 }
  0xe8   :  { %2534 = vtanh.f32 %v614_v56  ;;  %v563_v7 = vrot.slane %v482_v61, %v2858_v40  ;;  %v624_v8 = vadd.f32 %v559_v63, %v353_v5  ;;  %v613_v9 = vadd.f32 %v535_v51, %v308_v6  ;;  %v2444_v10 = vpop.f32.mrb[6].mxu1 }
  0xe9   :  { %v356_v12 = vpop.f32.mrb[7].mxu1  ;;  %2536 = vtanh.f32 %v622_v2  ;;  %v571_v23 = vrot.slane %v520_v13, %v2858_v40  ;;  %v530_v44 = vcombine.high %v520_v13, %v520_v13  ;;  %v528_v48 = vcombine.high %v506_v11, %v506_v11 }
  0xea   :  { %v626_v14 = vadd.f32 %v2443_v60, %v563_v7  ;;  %v627_v15 = vadd.f32 %v2444_v10, %v563_v7  ;;  %v625_v16 = vadd.f32 %v559_v63, %v356_v12  ;;  %2538 = vtanh.f32 %v621_v57 }
  0xeb   :  { %2540 = vtanh.f32 %v612_v59  ;;  %v499_v51 = vcombine.high %v497_v36, %v497_v36  ;;  %v579_v54 = vrot.slane %v530_v44, %v2858_v40  ;;  %v575_v58 = vrot.slane %v528_v48, %v2858_v40 }
  0xec   :  { %v2435_v19 = vpop.f32.mrb[8].mxu0  ;;  %2542 = vtanh.f32 %v615_v4  ;;  %v513_v13 = vrot.slane %v497_v36, %v2848_v27 }
  0xed   :  { %v2875_v21 = vadd.f32 %v2435_v19, %v547_v17  ;;  %v321_v22 = vpop.f32.mrb[9].mxu0  ;;  %2544 = vtanh.f32 %v623_v3  ;;  %v527_v3 = vrot.slane %v499_v51, %v2848_v27 }
  0xee   :  { %v2878_v25 = vadd.f32 %v543_v20, %v321_v22  ;;  %v2447_v28 = vpop.f32.mrb[8].mxu1  ;;  %v2436_v29 = vpop.f32.mrb[10].mxu0  ;;  %2546 = vtanh.f32 %v624_v8  ;;  %v583_v27 = vrot.slane %v513_v13, %v2858_v40 }
  0xef   :  { %v2881_v31 = vadd.f32 %v2447_v28, %v571_v23  ;;  %v619_v32 = vadd.f32 %v2436_v29, %v547_v17  ;;  %v369_v33 = vpop.f32.mrb[9].mxu1  ;;  %v324_v34 = vpop.f32.mrb[11].mxu0  ;;  %2548 = vtanh.f32 %v613_v9 }
  0xf0   :  { %v2889_v37 = vadd.f32 %v567_v30, %v369_v33  ;;  %v2891_v38 = vadd.f32 %v543_v20, %v324_v34  ;;  %v2448_v39 = vpop.f32.mrb[10].mxu1  ;;  %2550 = vtanh.f32 %v625_v16  ;;  %v587_v16 = vrot.slane %v527_v3, %v2858_v40 }
  0xf1   :  { %v2533_v41 = vpop.eup %2532  ;;  %v631_v42 = vadd.f32 %v2448_v39, %v571_v23  ;;  %v372_v43 = vpop.f32.mrb[11].mxu1  ;;  %2552 = vtanh.f32 %v626_v14 }
  0xf2   :  { %v2535_v45 = vpop.eup %2534  ;;  %v2893_v46 = vadd.f32 %v567_v30, %v372_v43  ;;  %v691_v47 = vmul.f32 %v2533_v41, %v2886_v35  ;;  %2554 = vtanh.f32 %v627_v15 }
  0xf3   :  { %v685_v49 = vmul.f32 %v2535_v45, %v2886_v35  ;;  %v2537_v50 = vpop.eup %2536  ;;  %2556 = vtanh.f32 %v2875_v21 }
  0xf4   :  { %v739_v52 = vsel %vm82_vm1, %v691_v47, 0.0  ;;  %v2539_v53 = vpop.eup %2538  ;;  %v693_v4 = vmul.f32 %v2537_v50, %v2886_v35  ;;  %2558 = vtanh.f32 %v619_v32  ;;  %v531_v32 = vcombine.high %v527_v3, %v527_v3 }
  0xf5   :  { %740 = vadd.xlane.f32.xlu0 %v739_v52  ;;  %v721_v55 = vsel %vm82_vm1, %v685_v49, 0.0  ;;  %v2541_v56 = vpop.eup %2540  ;;  %v692_v59 = vmul.f32 %v2539_v53, %v2886_v35  ;;  %2560 = vtanh.f32 %v2881_v31 }
  0xf6   :  { %v2451_v57 = vpop.f32.mrb[12].mxu1  ;;  %722 = vadd.xlane.f32.xlu1 %v721_v55  ;;  %v683_v62 = vmul.f32 %v2541_v56, %v2886_v35  ;;  %v2543_v63 = vpop.eup %2542  ;;  %v745_v17 = vsel %vm82_vm1, %v693_v4, 0.0  ;;  %2562 = vtanh.f32 %v631_v42  ;;  %v529_v42 = vcombine.high %v513_v13, %v513_v13 }
  0xf7   :  { %v2902_v60 = vadd.f32 %v2451_v57, %v579_v54  ;;  %v385_v61 = vpop.f32.mrb[13].mxu1  ;;  %v2545_v5 = vpop.eup %2544  ;;  %v742_v8 = vsel %vm82_vm1, %v692_v59, 0.0  ;;  %v686_v10 = vmul.f32 %v2543_v63, %v2886_v35  ;;  %2564 = vtanh.f32 %v2878_v25 }
  0xf8   :  { %v2905_v1 = vadd.f32 %v575_v58, %v385_v61  ;;  %v2452_v2 = vpop.f32.mrb[14].mxu1  ;;  %v715_v9 = vsel %vm82_vm1, %v683_v62, 0.0  ;;  %v2547_v11 = vpop.eup %2546  ;;  %v694_v14 = vmul.f32 %v2545_v5, %v2886_v35  ;;  %2566 = vtanh.f32 %v2891_v38 }
  0xf9   :  { %v2909_v6 = vadd.f32 %v2452_v2, %v579_v54  ;;  %v388_v7 = vpop.f32.mrb[15].mxu1  ;;  %716 = vadd.xlane.f32.xlu0 %v715_v9  ;;  %v2549_v15 = vpop.eup %2548  ;;  %v724_v18 = vsel %vm82_vm1, %v686_v10, 0.0  ;;  %v695_v19 = vmul.f32 %v2547_v11, %v2886_v35  ;;  %v595_v48 = vrot.slane %v531_v32, %v2858_v40 }
  0xfa   :  { %v2914_v12 = vadd.f32 %v575_v58, %v388_v7  ;;  %743 = vadd.xlane.f32.xlu1 %v742_v8  ;;  %v2551_v20 = vpop.eup %2550  ;;  %v748_v30 = vsel %vm82_vm1, %v694_v14, 0.0  ;;  %v684_v43 = vmul.f32 %v2549_v15, %v2886_v35  ;;  %v591_v54 = vrot.slane %v529_v42, %v2858_v40 }
  0xfb   :  { %v2553_v33 = vpop.eup %2552  ;;  %v751_v39 = vsel %vm82_vm1, %v695_v19, 0.0  ;;  %v696_v41 = vmul.f32 %v2551_v20, %v2886_v35  ;;  %2568 = vtanh.f32 %v2889_v37 }
  0xfc   :  { %v2555_v31 = vpop.eup %2554  ;;  %v697_v45 = vmul.f32 %v2553_v33, %v2886_v35  ;;  %v718_v50 = vsel %vm82_vm1, %v684_v43, 0.0  ;;  %2570 = vtanh.f32 %v2893_v46 }
  0xfd   :  { %746 = vadd.xlane.f32.xlu0 %v745_v17  ;;  %v2557_v47 = vpop.eup %2556  ;;  %v754_v49 = vsel %vm82_vm1, %v696_v41, 0.0  ;;  %v698_v51 = vmul.f32 %v2555_v31, %v2886_v35  ;;  %2572 = vtanh.f32 %v2902_v60 }
  0xfe   :  { %v2455_v22 = vpop.f32.mrb[16].mxu1  ;;  %725 = vadd.xlane.f32.xlu1 %v724_v18  ;;  %v2559_v52 = vpop.eup %2558  ;;  %v757_v57 = vsel %vm82_vm1, %v697_v45, 0.0  ;;  %v689_v63 = vmul.f32 %v2557_v47, %v2886_v35  ;;  %2574 = vtanh.f32 %v2909_v6 }
  0xff   :  { %v2925_v21 = vadd.f32 %v2455_v22, %v587_v16  ;;  %v401_v23 = vpop.f32.mrb[17].mxu1  ;;  %v2561_v58 = vpop.eup %2560  ;;  %v760_v62 = vsel %vm82_vm1, %v698_v51, 0.0  ;;  %v690_v2 = vmul.f32 %v2559_v52, %v2886_v35  ;;  %2576 = vtanh.f32 %v2905_v1 }
 0x100   :  { %v2927_v28 = vadd.f32 %v583_v27, %v401_v23  ;;  %v2456_v29 = vpop.f32.mrb[18].mxu1  ;;  %v2563_v3 = vpop.eup %2562  ;;  %v733_v4 = vsel %vm82_vm1, %v689_v63, 0.0  ;;  %v701_v7 = vmul.f32 %v2561_v58, %v2886_v35  ;;  %2578 = vtanh.f32 %v2914_v12 }
 0x101   :  { %v639_v34 = vadd.f32 %v2456_v29, %v587_v16  ;;  %v404_v36 = vpop.f32.mrb[19].mxu1  ;;  %752 = vadd.xlane.f32.xlu0 %v751_v39  ;;  %v2565_v46 = vpop.eup %2564  ;;  %v736_v5 = vsel %vm82_vm1, %v690_v2, 0.0  ;;  %v702_v8 = vmul.f32 %v2563_v3, %v2886_v35  ;;  %2580 = vtanh.f32 %v2925_v21 }
 0x102   :  { %v2933_v44 = vadd.f32 %v583_v27, %v404_v36  ;;  %749 = vadd.xlane.f32.xlu1 %v748_v30  ;;  %v2567_v9 = vpop.eup %2566  ;;  %v769_v60 = vsel %vm82_vm1, %v701_v7, 0.0  ;;  %v687_v11 = vmul.f32 %v2565_v46, %v2886_v35 }
 0x103   :  { %v772_v6 = vsel %vm82_vm1, %v702_v8, 0.0  ;;  %v688_v13 = vmul.f32 %v2567_v9, %v2886_v35  ;;  %2582 = vtanh.f32 %v639_v34  ;;  %v3018_v8 = vand.u32 127, %v438_v24 }
 0x104   :  { %v727_v1 = vsel %vm82_vm1, %v687_v11, 0.0  ;;  %2584 = vtanh.f32 %v2927_v28 }
 0x105   :  { %719 = vadd.xlane.f32.xlu0 %v718_v50  ;;  %v2569_v10 = vpop.eup %2568  ;;  %v730_v12 = vsel %vm82_vm1, %v688_v13, 0.0  ;;  %2586 = vtanh.f32 %v2933_v44  ;;  %3800 = vst [vmem:[#allocation3_spill] sm:$0xff] %v3018_v8 }
 0x106   :  { %v2459_v53 = vpop.f32.mrb[20].mxu1  ;;  %755 = vadd.xlane.f32.xlu1 %v754_v49  ;;  %v2571_v14 = vpop.eup %2570  ;;  %v699_v16 = vmul.f32 %v2569_v10, %v2886_v35 }
 0x107   :  { %v2944_v25 = vadd.f32 %v2459_v53, %v595_v48  ;;  %v417_v38 = vpop.f32.mrb[21].mxu1  ;;  %v2573_v15 = vpop.eup %2572  ;;  %v700_v17 = vmul.f32 %v2571_v14, %v2886_v35  ;;  %v3034_v14 = vsub.s32 %v3018_v8, %v2845_v26 }
 0x108   :  { %v640_v55 = vadd.f32 %v591_v54, %v417_v38  ;;  %v2460_v56 = vpop.f32.mrb[22].mxu1  ;;  %v2575_v18 = vpop.eup %2574  ;;  %v763_v20 = vsel %vm82_vm1, %v699_v16, 0.0  ;;  %v705_v27 = vmul.f32 %v2573_v15, %v2886_v35 }
 0x109   :  { %v643_v59 = vadd.f32 %v2460_v56, %v595_v48  ;;  %v420_v61 = vpop.f32.mrb[23].mxu1  ;;  %758 = vadd.xlane.f32.xlu0 %v757_v57  ;;  %v2577_v19 = vpop.eup %2576  ;;  %v766_v22 = vsel %vm82_vm1, %v700_v17, 0.0  ;;  %v706_v21 = vmul.f32 %v2575_v18, %v2886_v35 }
 0x10a   :  { %v641_v37 = vadd.f32 %v591_v54, %v420_v61  ;;  %761 = vadd.xlane.f32.xlu1 %v760_v62  ;;  %v2579_v23 = vpop.eup %2578  ;;  %2588 = vtanh.f32 %v640_v55  ;;  %v781_v30 = vsel %vm82_vm1, %v705_v27, 0.0  ;;  %v703_v32 = vmul.f32 %v2577_v19, %v2886_v35 }
 0x10b   :  { %v2581_v29 = vpop.eup %2580  ;;  %v784_v28 = vsel %vm82_vm1, %v706_v21, 0.0  ;;  %v704_v33 = vmul.f32 %v2579_v23, %v2886_v35 }
 0x10c   :  { %2590 = vtanh.f32 %v641_v37  ;;  %v775_v39 = vsel %vm82_vm1, %v703_v32, 0.0  ;;  %v709_v43 = vmul.f32 %v2581_v29, %v2886_v35 }
 0x10d   :  { %734 = vadd.xlane.f32.xlu0 %v733_v4  ;;  %v2583_v34 = vpop.eup %2582  ;;  %2592 = vtanh.f32 %v2944_v25  ;;  %v778_v41 = vsel %vm82_vm1, %v704_v33, 0.0 }
 0x10e   :  { %737 = vadd.xlane.f32.xlu1 %v736_v5  ;;  %2594 = vtanh.f32 %v643_v59  ;;  %v2585_v36 = vpop.eup %2584  ;;  %v710_v31 = vmul.f32 %v2583_v34, %v2886_v35  ;;  %v793_v45 = vsel %vm82_vm1, %v709_v43, 0.0 }
 0x10f   :  { %v2587_v44 = vpop.eup %2586  ;;  %v707_v48 = vmul.f32 %v2585_v36, %v2886_v35 }
 0x110   :  { %v796_v47 = vsel %vm82_vm1, %v710_v31, 0.0  ;;  %v708_v49 = vmul.f32 %v2587_v44, %v2886_v35 }
 0x111   :  { %770 = vadd.xlane.f32.xlu0 %v769_v60  ;;  %v787_v52 = vsel %vm82_vm1, %v707_v48, 0.0  ;;  %v849_v60 = vadd.s32 4294967288, %v3018_v8 }
 0x112   :  { %773 = vadd.xlane.f32.xlu1 %v772_v6  ;;  %v790_v53 = vsel %vm82_vm1, %v708_v49, 0.0 }
 0x113   :  { %v3030_v13 = vsub.s32 %v849_v60, %v2845_v26 }
 0x114   :  { %v2589_v42 = vpop.eup %2588 }
 0x115   :  { %728 = vadd.xlane.f32.xlu0 %v727_v1  ;;  %v711_v54 = vmul.f32 %v2589_v42, %v2886_v35 }
 0x116   :  { %731 = vadd.xlane.f32.xlu1 %v730_v12  ;;  %v2591_v50 = vpop.eup %2590 }
 0x117   :  { %v2593_v51 = vpop.eup %2592  ;;  %v712_v25 = vmul.f32 %v2591_v50, %v2886_v35  ;;  %v799_v55 = vsel %vm82_vm1, %v711_v54, 0.0 }
 0x118   :  { %v2595_v38 = vpop.eup %2594  ;;  %v713_v57 = vmul.f32 %v2593_v51, %v2886_v35 }
 0x119   :  { %764 = vadd.xlane.f32.xlu0 %v763_v20  ;;  %v802_v56 = vsel %vm82_vm1, %v712_v25, 0.0  ;;  %v714_v58 = vmul.f32 %v2595_v38, %v2886_v35 }
 0x11a   :  { %767 = vadd.xlane.f32.xlu1 %v766_v22  ;;  %v805_v59 = vsel %vm82_vm1, %v713_v57, 0.0 }
 0x11b   :  { %v808_v61 = vsel %vm82_vm1, %v714_v58, 0.0 }
 0x11d   :  { %782 = vadd.xlane.f32.xlu0 %v781_v30 }
 0x11e   :  { %785 = vadd.xlane.f32.xlu1 %v784_v28 }
 0x121   :  { %776 = vadd.xlane.f32.xlu0 %v775_v39 }
 0x122   :  { %779 = vadd.xlane.f32.xlu1 %v778_v41 }
 0x125   :  { %794 = vadd.xlane.f32.xlu0 %v793_v45 }
 0x126   :  { %797 = vadd.xlane.f32.xlu1 %v796_v47 }
 0x129   :  { %788 = vadd.xlane.f32.xlu0 %v787_v52 }
 0x12a   :  { %791 = vadd.xlane.f32.xlu1 %v790_v53 }
 0x12d   :  { %800 = vadd.xlane.f32.xlu0 %v799_v55 }
 0x12e   :  { %803 = vadd.xlane.f32.xlu1 %v802_v56 }
 0x131   :  { %806 = vadd.xlane.f32.xlu0 %v805_v59 }
 0x132   :  { %809 = vadd.xlane.f32.xlu1 %v808_v61 }
 0x182   :  { %v2997_v62 = vpop.xlane.xlu0 %740 }
 0x183   :  { %v2999_v63 = vpop.xlane.xlu1 %722  ;;  %v886_v30 = vrot.slane %v2997_v62, %v3034_v14 }
 0x184   :  { %v859_v17 = vrot.slane %v2999_v63, %v3034_v14 }
 0x186   :  { %v3003_v3 = vpop.xlane.xlu0 %716 }
 0x187   :  { %v3001_v2 = vpop.xlane.xlu1 %743  ;;  %v848_v12 = vrot.slane %v3003_v3, %v3034_v14 }
 0x188   :  { %v890_v21 = vrot.slane %v3001_v2, %v3030_v13 }
 0x18a   :  { %v3005_v37 = vpop.xlane.xlu0 %746  ;;  %v891_v47 = vsel %vm854_vm2, %v890_v21, %v886_v30 }
 0x18b   :  { %v3007_v46 = vpop.xlane.xlu1 %725  ;;  %v895_v33 = vrot.slane %v3005_v37, %v3034_v14 }
 0x18c   :  { %v863_v16 = vrot.slane %v3007_v46, %v3030_v13 }
 0x18e   :  { %v3009_v35 = vpop.xlane.xlu0 %752  ;;  %v864_v28 = vsel %vm854_vm2, %v863_v16, %v859_v17 }
 0x18f   :  { %v3011_v4 = vpop.xlane.xlu1 %749  ;;  %v904_v48 = vrot.slane %v3009_v35, %v3034_v14 }
 0x190   :  { %v899_v32 = vrot.slane %v3011_v4, %v3030_v13 }
 0x192   :  { %v3015_v7 = vpop.xlane.xlu0 %719  ;;  %v900_v50 = vsel %vm854_vm2, %v899_v32, %v895_v33 }
 0x193   :  { %v3013_v5 = vpop.xlane.xlu1 %755  ;;  %v853_v24 = vrot.slane %v3015_v7, %v3030_v13 }
 0x194   :  { %v908_v34 = vrot.slane %v3013_v5, %v3030_v13 }
 0x195   :  { %v855_v18 = vsel %vm854_vm2, %v853_v24, %v848_v12 }
 0x196   :  { %v3022_v10 = vpop.xlane.xlu0 %758  ;;  %v992_v36 = vsel %vm991_vm3, %v864_v28, %v855_v18  ;;  %v909_v52 = vsel %vm854_vm2, %v908_v34, %v904_v48 }
 0x197   :  { %v3020_v9 = vpop.xlane.xlu1 %761  ;;  %v913_v43 = vrot.slane %v3022_v10, %v3034_v14 }
 0x198   :  { %v917_v41 = vrot.slane %v3020_v9, %v3030_v13 }
 0x19a   :  { %v3025_v6 = vpop.xlane.xlu0 %734  ;;  %v918_v38 = vsel %vm854_vm2, %v917_v41, %v913_v43 }
 0x19b   :  { %v3027_v11 = vpop.xlane.xlu1 %737  ;;  %v877_v19 = vrot.slane %v3025_v6, %v3034_v14 }
 0x19c   :  { %v881_v20 = vrot.slane %v3027_v11, %v3030_v13 }
 0x19e   :  { %v3038_v15 = vpop.xlane.xlu0 %770  ;;  %v882_v31 = vsel %vm854_vm2, %v881_v20, %v877_v19 }
 0x19f   :  { %v3040_v1 = vpop.xlane.xlu1 %773  ;;  %v931_v18 = vrot.slane %v3038_v15, %v3034_v14 }
 0x1a0   :  { %v935_v19 = vrot.slane %v3040_v1, %v3030_v13 }
 0x1a2   :  { %v3053_v22 = vpop.xlane.xlu0 %728  ;;  %v936_v32 = vsel %vm854_vm2, %v935_v19, %v931_v18 }
 0x1a3   :  { %v3055_v27 = vpop.xlane.xlu1 %731  ;;  %v868_v23 = vrot.slane %v3053_v22, %v3034_v14 }
 0x1a4   :  { %v872_v29 = vrot.slane %v3055_v27, %v3030_v13 }
 0x1a6   :  { %v873_v39 = vsel %vm854_vm2, %v872_v29, %v868_v23  ;;  %v3080_v42 = vpop.xlane.xlu0 %764 }
 0x1a7   :  { %v994_v44 = vsel %vm993_vm4, %v873_v39, %v992_v36  ;;  %v3082_v45 = vpop.xlane.xlu1 %767  ;;  %v922_v61 = vrot.slane %v3080_v42, %v3034_v14 }
 0x1a8   :  { %v996_v49 = vsel %vm995_vm5, %v882_v31, %v994_v44  ;;  %v926_v60 = vrot.slane %v3082_v45, %v3030_v13 }
 0x1a9   :  { %v998_v51 = vsel %vm997_vm6, %v891_v47, %v996_v49 }
 0x1aa   :  { %v1000_v53 = vsel %vm999_vm7, %v900_v50, %v998_v51  ;;  %v3092_v54 = vpop.xlane.xlu0 %782  ;;  %v927_v20 = vsel %vm854_vm2, %v926_v60, %v922_v61 }
 0x1ab   :  { %v3094_v25 = vpop.xlane.xlu1 %785  ;;  %v1002_v55 = vsel %vm1001_vm8, %v909_v52, %v1000_v53  ;;  %v949_v21 = vrot.slane %v3092_v54, %v3034_v14  ;;  %v1005_v36 = vsel %vm991_vm3, %v936_v32, %v927_v20  ;;  %v2716_v20 = vmov 0  }
 0x1ac   :  { %v1004_v56 = vsel %vm1003_vm9, %v918_v38, %v1002_v55  ;;  %v953_v23 = vrot.slane %v3094_v25, %v3030_v13  ;;  %2490 = vset.pattern.permute.xlu1 %v2716_v20  ;;  %2489 = vset.pattern.permute.xlu0 %v2716_v20 }
 0x1ad   :  { %v1015_v57 = vsel %vm1014_vm10, %v1004_v56, -inf }
 0x1ae   :  { %1016 = vmax.xlane.f32.xlu0 %v1015_v57  ;;  %v3100_v58 = vpop.xlane.xlu0 %776  ;;  %v954_v41 = vsel %vm854_vm2, %v953_v23, %v949_v21  ;;  %v3169_v21 = vsub.s32 1, %v2845_v26  ;;  %v3172_v23 = vsub.s32 2, %v2845_v26 }
 0x1af   :  { %v3102_v59 = vpop.xlane.xlu1 %779  ;;  %v940_v24 = vrot.slane %v3100_v58, %v3034_v14 }
 0x1b0   :  { %v944_v12 = vrot.slane %v3102_v59, %v3030_v13 }
 0x1b2   :  { %v3112_v16 = vpop.xlane.xlu0 %794  ;;  %v945_v29 = vsel %vm854_vm2, %v944_v12, %v940_v24 }
 0x1b3   :  { %v3114_v17 = vpop.xlane.xlu1 %797  ;;  %v1006_v39 = vsel %vm993_vm4, %v945_v29, %v1005_v36  ;;  %v967_v47 = vrot.slane %v3112_v16, %v3034_v14 }
 0x1b4   :  { %v971_v48 = vrot.slane %v3114_v17, %v3030_v13  ;;  %v1007_v51 = vsel %vm995_vm5, %v954_v41, %v1006_v39 }
 0x1b6   :  { %v3126_v30 = vpop.xlane.xlu0 %788  ;;  %v972_v56 = vsel %vm854_vm2, %v971_v48, %v967_v47  ;;  %v3184_v47 = vsub.s32 4, %v2845_v26 }
 0x1b7   :  { %v3128_v28 = vpop.xlane.xlu1 %791  ;;  %v958_v33 = vrot.slane %v3126_v30, %v3034_v14 }
 0x1b8   :  { %v962_v34 = vrot.slane %v3128_v28, %v3030_v13 }
 0x1ba   :  { %v963_v43 = vsel %vm854_vm2, %v962_v34, %v958_v33  ;;  %v3139_v31 = vpop.xlane.xlu0 %800  ;;  %v3177_v34 = vsub.s32 3, %v2845_v26 }
 0x1bb   :  { %v3141_v44 = vpop.xlane.xlu1 %803  ;;  %v976_v49 = vrot.slane %v3139_v31, %v3034_v14  ;;  %v1008_v52 = vsel %vm997_vm6, %v963_v43, %v1007_v51 }
 0x1bc   :  { %v980_v50 = vrot.slane %v3141_v44, %v3030_v13  ;;  %v1009_v60 = vsel %vm999_vm7, %v972_v56, %v1008_v52  ;;  %v3189_v52 = vsub.s32 5, %v2845_v26 }
 0x1be   :  { %v3153_v53 = vpop.xlane.xlu0 %806  ;;  %v981_v55 = vsel %vm854_vm2, %v980_v50, %v976_v49 }
 0x1bf   :  { %v3155_v38 = vpop.xlane.xlu1 %809  ;;  %v985_v57 = vrot.slane %v3153_v53, %v3034_v14  ;;  %v1010_v12 = vsel %vm1001_vm8, %v981_v55, %v1009_v60 }
 0x1c0   :  { %v989_v61 = vrot.slane %v3155_v38, %v3030_v13 }
 0x1c2   :  { %v990_v24 = vsel %vm854_vm2, %v989_v61, %v985_v57  ;;  %v3195_v57 = vsub.s32 6, %v2845_v26 }
 0x1c3   :  { %v1011_v18 = vsel %vm1003_vm9, %v990_v24, %v1010_v12 }
 0x1c4   :  { %v1018_v19 = vsel %vm1014_vm10, %v1011_v18, -inf  ;;  %v3201_v18 = vsub.s32 7, %v2845_v26 }
 0x1c5   :  { %1019 = vmax.xlane.f32.xlu1 %v1018_v19 }
 0x23b   :  { %v1017_v29 = vpop.xlane.xlu0 %1016 }
 0x23c   :  { %v1026_v32 = vrot.slane %v1017_v29, %v2858_v40  ;;  %v1030_v33 = vrot.slane %v1017_v29, %v3169_v21  ;;  %v1034_v36 = vrot.slane %v1017_v29, %v3172_v23  ;;  %v1038_v48 = vrot.slane %v1017_v29, %v3177_v34 }
 0x23e   :  { %v1103_v39 = vsub.f32 %v3003_v3, %v1026_v32  ;;  %v1104_v41 = vsub.f32 %v3015_v7, %v1026_v32  ;;  %v1105_v43 = vsub.f32 %v2999_v63, %v1030_v33  ;;  %v1108_v49 = vsub.f32 %v3055_v27, %v1034_v36 }
 0x23f   :  { %v1042_v3 = vrot.slane %v1017_v29, %v3184_v47  ;;  %v1110_v7 = vsub.f32 %v3027_v11, %v1038_v48  ;;  %v1106_v56 = vsub.f32 %v3007_v46, %v1030_v33  ;;  %v1046_v27 = vrot.slane %v1017_v29, %v3189_v52 }
 0x240   :  { %v1135_v50 = vmul.f32 1.442695, %v1103_v39  ;;  %v1137_v51 = vmul.f32 1.442695, %v1104_v41  ;;  %v1139_v55 = vmul.f32 1.442695, %v1105_v43  ;;  %v1107_v24 = vsub.f32 %v3053_v22, %v1034_v36 }
 0x241   :  { %v1145_v63 = vmul.f32 1.442695, %v1108_v49  ;;  %v1112_v61 = vsub.f32 %v3001_v2, %v1042_v3  ;;  %v1149_v60 = vmul.f32 1.442695, %v1110_v7  ;;  %v1141_v12 = vmul.f32 1.442695, %v1106_v56 }
 0x242   :  { %2596 = vpow2.f32 %v1135_v50  ;;  %v1050_v11 = vrot.slane %v1017_v29, %v3195_v57  ;;  %v1114_v46 = vsub.f32 %v3011_v4, %v1046_v27  ;;  %v1109_v32 = vsub.f32 %v3025_v6, %v1038_v48 }
 0x243   :  { %2598 = vpow2.f32 %v1137_v51  ;;  %v1153_v19 = vmul.f32 1.442695, %v1112_v61  ;;  %v1143_v2 = vmul.f32 1.442695, %v1107_v24  ;;  %v1054_v22 = vrot.slane %v1017_v29, %v3201_v18 }
 0x244   :  { %2600 = vpow2.f32 %v1139_v55  ;;  %v1116_v36 = vsub.f32 %v3013_v5, %v1050_v11  ;;  %v1157_v4 = vmul.f32 1.442695, %v1114_v46  ;;  %v1111_v41 = vsub.f32 %v2997_v62, %v1042_v3 }
 0x245   :  { %2602 = vpow2.f32 %v1145_v63  ;;  %v1147_v6 = vmul.f32 1.442695, %v1109_v32  ;;  %v1118_v49 = vsub.f32 %v3020_v9, %v1054_v22  ;;  %v1113_v50 = vsub.f32 %v3005_v37, %v1046_v27 }
 0x246   :  { %2604 = vpow2.f32 %v1149_v60  ;;  %v1161_v29 = vmul.f32 1.442695, %v1116_v36  ;;  %v1151_v62 = vmul.f32 1.442695, %v1111_v41  ;;  %v1115_v37 = vsub.f32 %v3009_v35, %v1050_v11 }
 0x247   :  { %2606 = vpow2.f32 %v1141_v12  ;;  %v1165_v3 = vmul.f32 1.442695, %v1118_v49  ;;  %v1155_v63 = vmul.f32 1.442695, %v1113_v50  ;;  %v1117_v35 = vsub.f32 %v3022_v10, %v1054_v22 }
 0x248   :  { %2608 = vpow2.f32 %v1153_v19  ;;  %v1159_v24 = vmul.f32 1.442695, %v1115_v37 }
 0x249   :  { %2610 = vpow2.f32 %v1143_v2  ;;  %v1163_v10 = vmul.f32 1.442695, %v1117_v35 }
 0x24a   :  { %2612 = vpow2.f32 %v1157_v4 }
 0x24b   :  { %2614 = vpow2.f32 %v1147_v6 }
 0x24c   :  { %v3205_v20 = vpop.eup %2596  ;;  %2616 = vpow2.f32 %v1161_v29 }
 0x24d   :  { %v3208_v33 = vpop.eup %2598  ;;  %1232 = vperm.xlu0 %2489, %v3205_v20   ;;  %2618 = vpow2.f32 %v1151_v62 }
 0x24e   :  { %1235 = vperm.xlu1 %2490, %v3208_v33   ;;  %v3214_v39 = vpop.eup %2600  ;;  %2620 = vpow2.f32 %v1165_v3 }
 0x24f   :  { %v3217_v48 = vpop.eup %2602  ;;  %2622 = vpow2.f32 %v1155_v63 }
 0x250   :  { %v3226_v51 = vpop.eup %2604 }
 0x251   :  { %1247 = vperm.xlu0 %2489, %v3217_v48   ;;  %v3228_v55 = vpop.eup %2606 }
 0x252   :  { %v1020_v43 = vpop.xlane.xlu1 %1019  ;;  %1238 = vperm.xlu1 %2490, %v3214_v39   ;;  %v3238_v56 = vpop.eup %2608 }
 0x253   :  { %v3223_v5 = vrot.slane %v1020_v43, %v3172_v23  ;;  %v3232_v7 = vrot.slane %v1020_v43, %v3177_v34  ;;  %v3240_v27 = vpop.eup %2610  ;;  %v3244_v61 = vrot.slane %v1020_v43, %v3184_v47  ;;  %v1058_v12 = vrot.slane %v1020_v43, %v2858_v40 }
 0x254   :  { %v3251_v11 = vpop.eup %2612  ;;  %v3257_v19 = vrot.slane %v1020_v43, %v3189_v52  ;;  %v3269_v4 = vrot.slane %v1020_v43, %v3195_v57  ;;  %v1062_v6 = vrot.slane %v1020_v43, %v3169_v21  ;;  %v3282_v62 = vrot.slane %v1020_v43, %v3201_v18 }
 0x255   :  { %1253 = vperm.xlu0 %2489, %v3226_v51   ;;  %v1124_v9 = vsub.f32 %v3102_v59, %v3223_v5  ;;  %v1126_v60 = vsub.f32 %v3094_v25, %v3232_v7  ;;  %v3253_v46 = vpop.eup %2614  ;;  %v1128_v25 = vsub.f32 %v3128_v28, %v3244_v61  ;;  %v1119_v2 = vsub.f32 %v3080_v42, %v1058_v12 }
 0x256   :  { %1241 = vperm.xlu1 %2490, %v3228_v55   ;;  %v3263_v22 = vpop.eup %2616  ;;  %v1130_v28 = vsub.f32 %v3114_v17, %v3257_v19  ;;  %v1120_v42 = vsub.f32 %v3082_v45, %v1058_v12  ;;  %v1132_v17 = vsub.f32 %v3141_v44, %v3269_v4  ;;  %v1134_v43 = vsub.f32 %v3155_v38, %v3282_v62 }
 0x257   :  { %v1177_v59 = vmul.f32 1.442695, %v1124_v9  ;;  %v1181_v32 = vmul.f32 1.442695, %v1126_v60  ;;  %v3265_v36 = vpop.eup %2618  ;;  %v1185_v41 = vmul.f32 1.442695, %v1128_v25  ;;  %v1121_v9 = vsub.f32 %v3038_v15, %v1062_v6 }
 0x258   :  { %v1167_v49 = vmul.f32 1.442695, %v1119_v2  ;;  %v3276_v29 = vpop.eup %2620  ;;  %v1189_v3 = vmul.f32 1.442695, %v1130_v28  ;;  %v1169_v45 = vmul.f32 1.442695, %v1120_v42  ;;  %v1122_v44 = vsub.f32 %v3040_v1, %v1062_v6 }
 0x259   :  { %1259 = vperm.xlu0 %2489, %v3238_v56   ;;  %2624 = vpow2.f32 %v1177_v59  ;;  %v3278_v50 = vpop.eup %2622  ;;  %v1193_v60 = vmul.f32 1.442695, %v1132_v17  ;;  %v1171_v59 = vmul.f32 1.442695, %v1121_v9  ;;  %v1123_v38 = vsub.f32 %v3100_v58, %v3223_v5 }
 0x25a   :  { %1244 = vperm.xlu1 %2490, %v3240_v27   ;;  %2626 = vpow2.f32 %v1159_v24  ;;  %v1197_v24 = vmul.f32 1.442695, %v1134_v43  ;;  %v1173_v12 = vmul.f32 1.442695, %v1122_v44  ;;  %v1127_v58 = vsub.f32 %v3126_v30, %v3244_v61 }
 0x25b   :  { %2628 = vpow2.f32 %v1181_v32  ;;  %v1125_v32 = vsub.f32 %v3092_v54, %v3232_v7  ;;  %v1129_v54 = vsub.f32 %v3112_v16, %v3257_v19  ;;  %v1131_v30 = vsub.f32 %v3139_v31, %v3269_v4 }
 0x25c   :  { %2630 = vpow2.f32 %v1163_v10  ;;  %v1175_v10 = vmul.f32 1.442695, %v1123_v38  ;;  %v1183_v7 = vmul.f32 1.442695, %v1127_v58  ;;  %v1133_v16 = vsub.f32 %v3153_v53, %v3282_v62 }
 0x25d   :  { %1265 = vperm.xlu0 %2489, %v3251_v11   ;;  %2632 = vpow2.f32 %v1185_v41  ;;  %v1179_v5 = vmul.f32 1.442695, %v1125_v32  ;;  %v1187_v61 = vmul.f32 1.442695, %v1129_v54  ;;  %v1191_v19 = vmul.f32 1.442695, %v1131_v30 }
 0x25e   :  { %1250 = vperm.xlu1 %2490, %v3253_v46   ;;  %2634 = vpow2.f32 %v1167_v49  ;;  %v1195_v9 = vmul.f32 1.442695, %v1133_v16 }
 0x25f   :  { %2636 = vpow2.f32 %v1189_v3 }
 0x260   :  { %2638 = vpow2.f32 %v1169_v45 }
 0x261   :  { %1271 = vperm.xlu0 %2489, %v3263_v22   ;;  %2640 = vpow2.f32 %v1193_v60 }
 0x262   :  { %1256 = vperm.xlu1 %2490, %v3265_v36   ;;  %2642 = vpow2.f32 %v1171_v59 }
 0x263   :  { %v3288_v37 = vpop.eup %2624  ;;  %2644 = vpow2.f32 %v1197_v24 }
 0x264   :  { %v3290_v63 = vpop.eup %2626  ;;  %2646 = vpow2.f32 %v1173_v12 }
 0x265   :  { %1277 = vperm.xlu0 %2489, %v3276_v29   ;;  %v3297_v15 = vpop.eup %2628  ;;  %2648 = vpow2.f32 %v1175_v10 }
 0x266   :  { %1262 = vperm.xlu1 %2490, %v3278_v50   ;;  %v3299_v35 = vpop.eup %2630  ;;  %2650 = vpow2.f32 %v1179_v5 }
 0x267   :  { %v3305_v25 = vpop.eup %2632  ;;  %2652 = vpow2.f32 %v1183_v7 }
 0x268   :  { %v3307_v1 = vpop.eup %2634  ;;  %2654 = vpow2.f32 %v1187_v61 }
 0x269   :  { %1295 = vperm.xlu0 %2489, %v3288_v37   ;;  %v3313_v2 = vpop.eup %2636  ;;  %2656 = vpow2.f32 %v1191_v19 }
 0x26a   :  { %1268 = vperm.xlu1 %2490, %v3290_v63   ;;  %v3315_v28 = vpop.eup %2638  ;;  %2658 = vpow2.f32 %v1195_v9 }
 0x26b   :  { %v3321_v41 = vpop.eup %2640 }
 0x26c   :  { %v3323_v6 = vpop.eup %2642 }
 0x26d   :  { %1301 = vperm.xlu0 %2489, %v3297_v15   ;;  %v3329_v42 = vpop.eup %2644 }
 0x26e   :  { %1274 = vperm.xlu1 %2490, %v3299_v35   ;;  %3801 = vst [vmem:[#allocation4_spill] sm:$0xff] %v3329_v42  ;;  %v3331_v49 = vpop.eup %2646 }
 0x26f   :  { %v3337_v17 = vpop.eup %2648 }
 0x270   :  { %v3342_v3 = vpop.eup %2650 }
 0x271   :  { %1307 = vperm.xlu0 %2489, %v3305_v25   ;;  %v3345_v45 = vpop.eup %2652 }
 0x272   :  { %1280 = vperm.xlu1 %2490, %v3307_v1   ;;  %v3348_v31 = vpop.eup %2654 }
 0x273   :  { %v3351_v4 = vpop.eup %2656 }
 0x274   :  { %v3354_v53 = vpop.eup %2658 }
 0x275   :  { %1313 = vperm.xlu0 %2489, %v3313_v2   ;;  %3802 = vst [vmem:[#allocation5_spill] sm:$0xff] %v3354_v53 }
 0x276   :  { %1283 = vperm.xlu1 %2490, %v3315_v28  }
 0x279   :  { %1319 = vperm.xlu0 %2489, %v3321_v41  }
 0x27a   :  { %1286 = vperm.xlu1 %2490, %v3323_v6  }
 0x27d   :  { %1325 = vperm.xlu0 %2489, %v3329_v42  }
 0x27e   :  { %1289 = vperm.xlu1 %2490, %v3331_v49  }
 0x282   :  { %1292 = vperm.xlu1 %2490, %v3337_v17  }
 0x286   :  { %1298 = vperm.xlu1 %2490, %v3342_v3  }
 0x28a   :  { %1304 = vperm.xlu1 %2490, %v3345_v45  }
 0x28e   :  { %1310 = vperm.xlu1 %2490, %v3348_v31  }
 0x292   :  { %1316 = vperm.xlu1 %2490, %v3351_v4  }
 0x296   :  { %1322 = vperm.xlu1 %2490, %v3354_v53  }
 0x2cc   :  { %v1233_v62 = vpop.permute.xlu0 %1232 }
 0x2cd   :  { %v1236_v43 = vpop.permute.xlu1 %1235  ;;  %v1330_v61 = vrot.slane %v1233_v62, %v3034_v14 }
 0x2ce   :  { %v1334_v16 = vrot.slane %v1236_v43, %v3030_v13 }
 0x2d0   :  { %v1248_v60 = vpop.permute.xlu0 %1247  ;;  %v1335_v43 = vsel %vm854_vm2, %v1334_v16, %v1330_v61 }
 0x2d1   :  { %v1239_v44 = vpop.permute.xlu1 %1238  ;;  %v1352_v0 = vrot.slane %v1248_v60, %v3030_v13 }
 0x2d2   :  { %v1339_v19 = vrot.slane %v1239_v44, %v3034_v14 }
 0x2d4   :  { %v1254_v59 = vpop.permute.xlu0 %1253 }
 0x2d5   :  { %v1242_v24 = vpop.permute.xlu1 %1241  ;;  %v1361_v8 = vrot.slane %v1254_v59, %v3030_v13 }
 0x2d6   :  { %v1343_v5 = vrot.slane %v1242_v24, %v3030_v13 }
 0x2d8   :  { %v1260_v38 = vpop.permute.xlu0 %1259  ;;  %v1344_v24 = vsel %vm854_vm2, %v1343_v5, %v1339_v19 }
 0x2d9   :  { %v1245_v12 = vpop.permute.xlu1 %1244  ;;  %v1370_v42 = vrot.slane %v1260_v38, %v3030_v13 }
 0x2da   :  { %v1348_v54 = vrot.slane %v1245_v12, %v3034_v14 }
 0x2dc   :  { %v1266_v10 = vpop.permute.xlu0 %1265  ;;  %v1353_v62 = vsel %vm854_vm2, %v1352_v0, %v1348_v54 }
 0x2dd   :  { %v1251_v32 = vpop.permute.xlu1 %1250  ;;  %v1379_v44 = vrot.slane %v1266_v10, %v3030_v13 }
 0x2de   :  { %v1357_v9 = vrot.slane %v1251_v32, %v3034_v14 }
 0x2e0   :  { %v1272_v7 = vpop.permute.xlu0 %1271  ;;  %v1362_v32 = vsel %vm854_vm2, %v1361_v8, %v1357_v9 }
 0x2e1   :  { %v1257_v58 = vpop.permute.xlu1 %1256  ;;  %v1388_v59 = vrot.slane %v1272_v7, %v3030_v13 }
 0x2e2   :  { %v1366_v26 = vrot.slane %v1257_v58, %v3034_v14  ;;  %v1471_v58 = vsel %vm991_vm3, %v1344_v24, %v1335_v43 }
 0x2e3   :  { %v1472_v38 = vsel %vm993_vm4, %v1353_v62, %v1471_v58 }
 0x2e4   :  { %v1371_v5 = vsel %vm854_vm2, %v1370_v42, %v1366_v26  ;;  %v1473_v54 = vsel %vm995_vm5, %v1362_v32, %v1472_v38 }
 0x2e5   :  { %v1263_v30 = vpop.permute.xlu1 %1262  ;;  %v1474_v8 = vsel %vm997_vm6, %v1371_v5, %v1473_v54 }
 0x2e6   :  { %v1375_v12 = vrot.slane %v1263_v30, %v3034_v14  ;;  %v1278_v30 = vpop.permute.xlu0 %1277 }
 0x2e8   :  { %v1380_v0 = vsel %vm854_vm2, %v1379_v44, %v1375_v12 }
 0x2e9   :  { %v1269_v53 = vpop.permute.xlu1 %1268  ;;  %v1475_v7 = vsel %vm999_vm7, %v1380_v0, %v1474_v8 }
 0x2ea   :  { %v1384_v60 = vrot.slane %v1269_v53, %v3034_v14  ;;  %v1397_v53 = vrot.slane %v1278_v30, %v3030_v13  ;;  %v1296_v12 = vpop.permute.xlu0 %1295 }
 0x2ec   :  { %v1389_v61 = vsel %vm854_vm2, %v1388_v59, %v1384_v60 }
 0x2ed   :  { %v1275_v10 = vpop.permute.xlu1 %1274  ;;  %v1476_v42 = vsel %vm1001_vm8, %v1389_v61, %v1475_v7 }
 0x2ee   :  { %v1393_v16 = vrot.slane %v1275_v10, %v3034_v14  ;;  %v1302_v44 = vpop.permute.xlu0 %1301 }
 0x2f0   :  { %v1398_v26 = vsel %vm854_vm2, %v1397_v53, %v1393_v16  ;;  %v1424_v16 = vrot.slane %v1296_v12, %v3030_v13 }
 0x2f1   :  { %v1281_v19 = vpop.permute.xlu1 %1280  ;;  %v1477_v9 = vsel %vm1003_vm9, %v1398_v26, %v1476_v42  ;;  %v1433_v26 = vrot.slane %v1302_v44, %v3030_v13 }
 0x2f2   :  { %v1487_v24 = vsel %vm1014_vm10, %v1477_v9, 0.0  ;;  %v1308_v60 = vpop.permute.xlu0 %1307  ;;  %v1402_v42 = vrot.slane %v1281_v19, %v3034_v14 }
 0x2f3   :  { %1488 = vadd.xlane.f32.xlu1 %v1487_v24 }
 0x2f5   :  { %v1284_v62 = vpop.permute.xlu1 %1283 }
 0x2f6   :  { %v1314_v5 = vpop.permute.xlu0 %1313  ;;  %v1406_v10 = vrot.slane %v1284_v62, %v3030_v13 }
 0x2f9   :  { %v1287_v43 = vpop.permute.xlu1 %1286 }
 0x2fa   :  { %v1320_v0 = vpop.permute.xlu0 %1319  ;;  %v1411_v8 = vrot.slane %v1287_v43, %v3034_v14  ;;  %v1451_v43 = vrot.slane %v1314_v5, %v3030_v13 }
 0x2fb   :  { %v1460_v44 = vrot.slane %v1320_v0, %v3030_v13 }
 0x2fd   :  { %v1290_v32 = vpop.permute.xlu1 %1289 }
 0x2fe   :  { %v1415_v38 = vrot.slane %v1290_v32, %v3030_v13  ;;  %v1442_v32 = vrot.slane %v1308_v60, %v3030_v13  ;;  %v1326_v19 = vpop.permute.xlu0 %1325 }
 0x300   :  { %v1416_v9 = vsel %vm854_vm2, %v1415_v38, %v1411_v8 }
 0x301   :  { %v1293_v58 = vpop.permute.xlu1 %1292 }
 0x302   :  { %v1420_v54 = vrot.slane %v1293_v58, %v3034_v14 }
 0x304   :  { %v1425_v62 = vsel %vm854_vm2, %v1424_v16, %v1420_v54 }
 0x305   :  { %v1299_v59 = vpop.permute.xlu1 %1298 }
 0x306   :  { %v1429_v53 = vrot.slane %v1299_v59, %v3034_v14  ;;  %v1407_v59 = vsel %vm854_vm2, %v1406_v10, %v1402_v42 }
 0x307   :  { %v1478_v38 = vsel %vm991_vm3, %v1416_v9, %v1407_v59 }
 0x308   :  { %v1434_v12 = vsel %vm854_vm2, %v1433_v26, %v1429_v53  ;;  %v1479_v60 = vsel %vm993_vm4, %v1425_v62, %v1478_v38  ;;  %v1469_v53 = vrot.slane %v1326_v19, %v3030_v13 }
 0x309   :  { %v1305_v30 = vpop.permute.xlu1 %1304  ;;  %v1480_v8 = vsel %vm995_vm5, %v1434_v12, %v1479_v60 }
 0x30a   :  { %v1438_v7 = vrot.slane %v1305_v30, %v3034_v14 }
 0x30d   :  { %v1311_v61 = vpop.permute.xlu1 %1310 }
 0x30e   :  { %v1447_v24 = vrot.slane %v1311_v61, %v3034_v14  ;;  %v1443_v61 = vsel %vm854_vm2, %v1442_v32, %v1438_v7 }
 0x30f   :  { %v1481_v16 = vsel %vm997_vm6, %v1443_v61, %v1480_v8 }
 0x310   :  { %v1452_v54 = vsel %vm854_vm2, %v1451_v43, %v1447_v24 }
 0x311   :  { %v1317_v58 = vpop.permute.xlu1 %1316  ;;  %v1482_v26 = vsel %vm999_vm7, %v1452_v54, %v1481_v16 }
 0x312   :  { %v1456_v30 = vrot.slane %v1317_v58, %v3034_v14 }
 0x314   :  { %v1461_v5 = vsel %vm854_vm2, %v1460_v44, %v1456_v30 }
 0x315   :  { %v1323_v10 = vpop.permute.xlu1 %1322  ;;  %v1483_v7 = vsel %vm1001_vm8, %v1461_v5, %v1482_v26 }
 0x316   :  { %v1465_v0 = vrot.slane %v1323_v10, %v3034_v14 }
 0x318   :  { %v1470_v42 = vsel %vm854_vm2, %v1469_v53, %v1465_v0 }
 0x319   :  { %v1484_v9 = vsel %vm1003_vm9, %v1470_v42, %v1483_v7 }
 0x31a   :  { %v1490_v24 = vsel %vm1014_vm10, %v1484_v9, 0.0 }
 0x31b   :  { %1491 = vadd.xlane.f32.xlu0 %v1490_v24 }
 0x380   :  { %v1489_v32 = vpop.xlane.xlu1 %1488 }
 0x381   :  { %v1498_v62 = vrot.slane %v1489_v32, %v2858_v40  ;;  %v1502_v13 = vrot.slane %v1489_v32, %v3169_v21  ;;  %v1506_v14 = vrot.slane %v1489_v32, %v3172_v23  ;;  %v1510_v58 = vrot.slane %v1489_v32, %v3177_v34 }
 0x382   :  { %v1514_v59 = vrot.slane %v1489_v32, %v3184_v47  ;;  %v1518_v19 = vrot.slane %v1489_v32, %v3189_v52  ;;  %v1522_v54 = vrot.slane %v1489_v32, %v3195_v57  ;;  %v1526_v5 = vrot.slane %v1489_v32, %v3201_v18 }
 0x383   :  { %2660 = vrcp.f32 %v1498_v62 }
 0x384   :  { %2662 = vrcp.f32 %v1502_v13 }
 0x385   :  { %2664 = vrcp.f32 %v1506_v14 }
 0x386   :  { %2666 = vrcp.f32 %v1510_v58 }
 0x387   :  { %2668 = vrcp.f32 %v1514_v59 }
 0x388   :  { %2670 = vrcp.f32 %v1518_v19  ;;  %v3806_v19 = vld [vmem:[#allocation3_spill] sm:$0xff] }
 0x389   :  { %2672 = vrcp.f32 %v1522_v54 }
 0x38a   :  { %2674 = vrcp.f32 %v1526_v5 }
 0x38d   :  { %v2661_v43 = vpop.eup %2660 }
 0x38e   :  { %v1577_v12 = vmul.f32 %v2661_v43, %v3208_v33  ;;  %v1576_v30 = vmul.f32 %v2661_v43, %v3205_v20  ;;  %v2663_v44 = vpop.eup %2662 }
 0x38f   :  { %v1579_v38 = vmul.f32 %v2663_v44, %v3214_v39  ;;  %v1580_v61 = vmul.f32 %v2663_v44, %v3228_v55  ;;  %v2665_v60 = vpop.eup %2664  ;;  %v2515_v44 = vld [vmem:[%s3789_s5 + $0x8] sm:$0xff]  }
 0x390   :  { %1662 = vperm.xlu1 %2490, %v1577_v12   ;;  %1657 = vperm.xlu0 %2489, %v1576_v30   ;;  %v1582_v33 = vmul.f32 %v2665_v60, %v3240_v27  ;;  %v1583_v20 = vmul.f32 %v2665_v60, %v3217_v48  ;;  %v2667_v8 = vpop.eup %2666  ;;  %v2696_v30 = vld [vmem:[%s3785_s0] sm:$0xff]  }
 0x391   :  { %v1585_v39 = vmul.f32 %v2667_v8, %v3253_v46  ;;  %v1586_v55 = vmul.f32 %v2667_v8, %v3226_v51  ;;  %v2669_v10 = vpop.eup %2668  ;;  %v3807_v60 = vld [vmem:[#allocation2_spill] sm:$0xff] }
 0x392   :  { %v1588_v53 = vmul.f32 %v2669_v10, %v3265_v36  ;;  %v1589_v27 = vmul.f32 %v2669_v10, %v3238_v56  ;;  %v2671_v16 = vpop.eup %2670 }
 0x393   :  { %v1591_v48 = vmul.f32 %v2671_v16, %v3278_v50  ;;  %v1592_v0 = vmul.f32 %v2671_v16, %v3251_v11  ;;  %v2673_v26 = vpop.eup %2672 }
 0x394   :  { %1667 = vperm.xlu1 %2490, %v1579_v38   ;;  %1672 = vperm.xlu0 %2489, %v1580_v61   ;;  %v1594_v51 = vmul.f32 %v2673_v26, %v3290_v63  ;;  %v1595_v46 = vmul.f32 %v2673_v26, %v3263_v22  ;;  %v2675_v42 = vpop.eup %2674  ;;  %v2178_v38 = vadd.s32 4294967256, %v3806_v19  ;;  %v2173_v61 = vadd.s32 4294967264, %v3806_v19 }
 0x395   :  { %v1597_v9 = vmul.f32 %v2675_v42, %v3299_v35  ;;  %v1598_v50 = vmul.f32 %v2675_v42, %v3276_v29 }
 0x396   :  { %v3493_v54 = vsub.s32 %v2178_v38, %v3807_v60 }
 0x398   :  { %1677 = vperm.xlu1 %2490, %v1582_v33   ;;  %1682 = vperm.xlu0 %2489, %v1583_v20   ;;  %v3496_v33 = vsub.s32 %v2173_v61, %v3807_v60  ;;  %v2697_v20 = vld [vmem:[%s3786_s1] sm:$0xff]  }
 0x399   :  { %v1624_v8 = vunpack.c.h.bf16 %v2697_v20  ;;  %v1623_v5 = vunpack.c.l.bf16 %v2697_v20 }
 0x39c   :  { %1687 = vperm.xlu1 %2490, %v1585_v39   ;;  %1692 = vperm.xlu0 %2489, %v1586_v55  }
 0x3a0   :  { %1697 = vperm.xlu1 %2490, %v1588_v53   ;;  %1702 = vperm.xlu0 %2489, %v1589_v27   ;;  %v2698_v27 = vld [vmem:[%s3786_s1 + $0x8] sm:$0xff]  }
 0x3a1   :  { %v1625_v16 = vunpack.c.l.bf16 %v2698_v27 }
 0x3a4   :  { %1707 = vperm.xlu1 %2490, %v1591_v48   ;;  %1712 = vperm.xlu0 %2489, %v1592_v0   ;;  %v1626_v48 = vunpack.c.h.bf16 %v2698_v27 }
 0x3a8   :  { %v1492_v7 = vpop.xlane.xlu0 %1491  ;;  %1717 = vperm.xlu1 %2490, %v1594_v51   ;;  %1722 = vperm.xlu0 %2489, %v1595_v46  }
 0x3a9   :  { %v1530_v56 = vrot.slane %v1492_v7, %v2858_v40  ;;  %v1534_v36 = vrot.slane %v1492_v7, %v3169_v21  ;;  %v1538_v11 = vrot.slane %v1492_v7, %v3172_v23  ;;  %v1542_v22 = vrot.slane %v1492_v7, %v3177_v34 }
 0x3aa   :  { %v1546_v24 = vrot.slane %v1492_v7, %v3184_v47  ;;  %v1550_v29 = vrot.slane %v1492_v7, %v3189_v52  ;;  %v1554_v34 = vrot.slane %v1492_v7, %v3195_v57  ;;  %v1558_v52 = vrot.slane %v1492_v7, %v3201_v18 }
 0x3ab   :  { %2676 = vrcp.f32 %v1530_v56 }
 0x3ac   :  { %1727 = vperm.xlu1 %2490, %v1597_v9   ;;  %1732 = vperm.xlu0 %2489, %v1598_v50   ;;  %2678 = vrcp.f32 %v1534_v36 }
 0x3ad   :  { %2680 = vrcp.f32 %v1538_v11 }
 0x3ae   :  { %2682 = vrcp.f32 %v1542_v22 }
 0x3af   :  { %2684 = vrcp.f32 %v1546_v24 }
 0x3b0   :  { %2686 = vrcp.f32 %v1550_v29 }
 0x3b1   :  { %2688 = vrcp.f32 %v1554_v34  ;;  %v2699_v34 = vld [vmem:[%s3786_s1 + $0x10] sm:$0xff]  }
 0x3b2   :  { %2690 = vrcp.f32 %v1558_v52 }
 0x3b5   :  { %v2677_v63 = vpop.eup %2676 }
 0x3b6   :  { %v1600_v40 = vmul.f32 %v2677_v63, %v3307_v1  ;;  %v1601_v21 = vmul.f32 %v2677_v63, %v3315_v28  ;;  %v2679_v35 = vpop.eup %2678 }
 0x3b7   :  { %v1603_v32 = vmul.f32 %v2679_v35, %v3323_v6  ;;  %v1604_v23 = vmul.f32 %v2679_v35, %v3331_v49  ;;  %v2681_v62 = vpop.eup %2680 }
 0x3b8   :  { %1737 = vperm.xlu1 %2490, %v1600_v40   ;;  %1742 = vperm.xlu0 %2489, %v1601_v21   ;;  %v1606_v47 = vmul.f32 %v2681_v62, %v3337_v17  ;;  %v1607_v1 = vmul.f32 %v2681_v62, %v3288_v37  ;;  %v2683_v28 = vpop.eup %2682 }
 0x3b9   :  { %v1609_v6 = vmul.f32 %v2683_v28, %v3342_v3  ;;  %v1610_v49 = vmul.f32 %v2683_v28, %v3297_v15  ;;  %v2685_v13 = vpop.eup %2684 }
 0x3ba   :  { %v1612_v57 = vmul.f32 %v2685_v13, %v3345_v45  ;;  %v1613_v17 = vmul.f32 %v2685_v13, %v3305_v25  ;;  %v2687_v14 = vpop.eup %2686  ;;  %v3803_v45 = vld [vmem:[#allocation5_spill] sm:$0xff]  ;;  %v3804_v25 = vld [vmem:[#allocation4_spill] sm:$0xff] }
 0x3bb   :  { %v1615_v37 = vmul.f32 %v2687_v14, %v3348_v31  ;;  %v1616_v58 = vmul.f32 %v2687_v14, %v3313_v2  ;;  %v2689_v18 = vpop.eup %2688  ;;  %v2512_v2 = vld [vmem:[%s3788_s6] sm:$0xff]   ;;  %v3805_v31 = vmov 0.0  }
 0x3bc   :  { %1747 = vperm.xlu1 %2490, %v1603_v32   ;;  %1752 = vperm.xlu0 %2489, %v1604_v23   ;;  %v1618_v15 = vmul.f32 %v2689_v18, %v3351_v4  ;;  %v1619_v3 = vmul.f32 %v2689_v18, %v3321_v41  ;;  %v2691_v43 = vpop.eup %2690  ;;  %v2513_v41 = vld [vmem:[%s3788_s6 + $0x8] sm:$0xff]   ;;  %v2514_v4 = vld [vmem:[%s3789_s5] sm:$0xff]  }
 0x3bd   :  { %v1621_v59 = vmul.f32 %v2691_v43, %v3803_v45  ;;  %v1622_v12 = vmul.f32 %v2691_v43, %v3804_v25  ;;  %2462 = vmatpush3.bf16.msra.mxu0 %v2512_v2  ;;  %v2700_v25 = vld [vmem:[%s3786_s1 + $0x18] sm:$0xff]  }
 0x3be   :  { %2463 = vmatprep.subr.bf16.mxu0 %v3805_v31  ;;  %v1630_v2 = vunpack.c.h.bf16 %v2700_v25 }
 0x3c0   :  { %1757 = vperm.xlu1 %2490, %v1606_v47   ;;  %1762 = vperm.xlu0 %2489, %v1607_v1   ;;  %v1627_v47 = vunpack.c.l.bf16 %v2699_v34  ;;  %v1628_v1 = vunpack.c.h.bf16 %v2699_v34 }
 0x3c1   :  { %2464 = vmatpush3.bf16.msra.mxu0 %v2513_v41 }
 0x3c2   :  { %2469 = vmatprep.subr.bf16.mxu0 %v3805_v31 }
 0x3c4   :  { %1767 = vperm.xlu1 %2490, %v1609_v6   ;;  %1772 = vperm.xlu0 %2489, %v1610_v49  }
 0x3c5   :  { %2466 = vmatmul.mubr.msk.bf16.vlgmr.msra.gmra.mrb[12].mxu0 %vm82_vm1, %v2696_v30 }
 0x3c6   :  { %2470 = vmatpush3.bf16.msra.mxu0 %v2514_v4  ;;  %2473 = vmatprep.mubr.msk.bf16.mxu0 %vm2714_vm0, %v3805_v31 }
 0x3c7   :  { %2471 = vmatprep.subr.bf16.mxu0 %v3805_v31 }
 0x3c8   :  { %1777 = vperm.xlu1 %2490, %v1612_v57   ;;  %1782 = vperm.xlu0 %2489, %v1613_v17  }
 0x3ca   :  { %2472 = vmatpush3.bf16.msra.mxu0 %v2515_v44 }
 0x3cc   :  { %1787 = vperm.xlu1 %2490, %v1615_v37   ;;  %1792 = vperm.xlu0 %2489, %v1616_v58  }
 0x3d0   :  { %1797 = vperm.xlu1 %2490, %v1618_v15   ;;  %1802 = vperm.xlu0 %2489, %v1619_v3  }
 0x3d4   :  { %1807 = vperm.xlu1 %2490, %v1621_v59   ;;  %1812 = vperm.xlu0 %2489, %v1622_v12   ;;  %v1629_v12 = vunpack.c.l.bf16 %v2700_v25 }
 0x40f   :  { %v1663_v39 = vpop.permute.xlu1 %1662  ;;  %v1658_v55 = vpop.permute.xlu0 %1657 }
 0x410   :  { %v2182_v10 = vrot.slane %v1663_v39, %v3493_v54  ;;  %v2177_v53 = vrot.slane %v1658_v55, %v3496_v33  ;;  %v1816_v0 = vmul.f32 %v1663_v39, %v1624_v8  ;;  %v1815_v26 = vmul.f32 %v1658_v55, %v1623_v5 }
 0x412   :  { %v2184_v51 = vsel %vm2183_vm11, %v2182_v10, %v2177_v53  ;;  %v1848_v50 = vsel %vm82_vm1, %v1816_v0, 0.0  ;;  %v1847_v11 = vsel %vm82_vm1, %v1815_v26, 0.0 }
 0x413   :  { %v1668_v46 = vpop.permute.xlu1 %1667  ;;  %v1673_v42 = vpop.permute.xlu0 %1672  ;;  %v1849_v29 = vadd.f32 %v1848_v50, %v1847_v11  ;;  %v2702_v50 = vld [vmem:[%s3786_s1 + $0x28] sm:$0xff]  }
 0x414   :  { %v1817_v7 = vmul.f32 %v1668_v46, %v1625_v16  ;;  %v2188_v56 = vrot.slane %v1668_v46, %v3496_v33  ;;  %v1818_v36 = vmul.f32 %v1673_v42, %v1626_v48  ;;  %v2192_v9 = vrot.slane %v1673_v42, %v3493_v54  ;;  %v2701_v46 = vld [vmem:[%s3786_s1 + $0x20] sm:$0xff]  }
 0x415   :  { %v1850_v13 = vrot.slane %v1849_v29, 4  ;;  %v1631_v42 = vunpack.c.l.bf16 %v2701_v46  ;;  %v1633_v11 = vunpack.c.l.bf16 %v2702_v50 }
 0x416   :  { %v2193_v22 = vsel %vm2183_vm11, %v2192_v9, %v2188_v56  ;;  %v1856_v63 = vsel %vm82_vm1, %v1817_v7, 0.0  ;;  %v1857_v24 = vsel %vm82_vm1, %v1818_v36, 0.0  ;;  %v1632_v9 = vunpack.c.h.bf16 %v2701_v46 }
 0x417   :  { %v2320_v40 = vsel %vm991_vm3, %v2193_v22, %v2184_v51  ;;  %v1678_v21 = vpop.permute.xlu1 %1677  ;;  %v1683_v35 = vpop.permute.xlu0 %1682  ;;  %v1858_v62 = vadd.f32 %v1857_v24, %v1856_v63  ;;  %v1851_v43 = vadd.f32 %v1850_v13, %v1849_v29  ;;  %v1634_v22 = vunpack.c.h.bf16 %v2702_v50 }
 0x418   :  { %v2197_v32 = vrot.slane %v1678_v21, %v3496_v33  ;;  %v2201_v23 = vrot.slane %v1683_v35, %v3493_v54  ;;  %v1819_v37 = vmul.f32 %v1678_v21, %v1627_v47  ;;  %v1820_v58 = vmul.f32 %v1683_v35, %v1628_v1 }
 0x419   :  { %v1859_v14 = vrot.slane %v1858_v62, 4  ;;  %v1852_v38 = vrot.slane %v1851_v43, 2 }
 0x41a   :  { %v2202_v28 = vsel %vm2183_vm11, %v2201_v23, %v2197_v32  ;;  %v1865_v41 = vsel %vm82_vm1, %v1819_v37, 0.0  ;;  %v1866_v4 = vsel %vm82_vm1, %v1820_v58, 0.0 }
 0x41b   :  { %v2321_v52 = vsel %vm993_vm4, %v2202_v28, %v2320_v40  ;;  %v1688_v6 = vpop.permute.xlu1 %1687  ;;  %v1693_v49 = vpop.permute.xlu0 %1692  ;;  %v1860_v31 = vadd.f32 %v1859_v14, %v1858_v62  ;;  %v1867_v20 = vadd.f32 %v1866_v4, %v1865_v41  ;;  %v1853_v48 = vadd.f32 %v1852_v38, %v1851_v43  ;;  %v2703_v40 = vld [vmem:[%s3786_s1 + $0x30] sm:$0xff]   ;;  %v3569_v62 = vld [vmem:[%s3786_s1 + $0x38] sm:$0xff]  }
 0x41c   :  { %v2206_v57 = vrot.slane %v1688_v6, %v3496_v33  ;;  %v2210_v17 = vrot.slane %v1693_v49, %v3493_v54  ;;  %v1821_v8 = vmul.f32 %v1688_v6, %v1629_v12  ;;  %v1822_v5 = vmul.f32 %v1693_v49, %v1630_v2  ;;  %v3601_v2 = vld [vmem:[%s3786_s1 + $0x58] sm:$0xff]  }
 0x41d   :  { %v1861_v55 = vrot.slane %v1860_v31, 2  ;;  %v1868_v0 = vrot.slane %v1867_v20, 4  ;;  %v1635_v21 = vunpack.c.l.bf16 %v2703_v40  ;;  %v1636_v35 = vunpack.c.h.bf16 %v2703_v40 }
 0x41e   :  { %v2211_v18 = vsel %vm2183_vm11, %v2210_v17, %v2206_v57  ;;  %v1874_v26 = vsel %vm82_vm1, %v1821_v8, 0.0  ;;  %v1875_v51 = vsel %vm82_vm1, %v1822_v5, 0.0  ;;  %v1854_v32 = vrot.slane %v1853_v48, 1  ;;  %v2705_v17 = vld [vmem:[%s3786_s1 + $0x40] sm:$0xff]  }
 0x41f   :  { %v1698_v15 = vpop.permute.xlu1 %1697  ;;  %v1703_v3 = vpop.permute.xlu0 %1702  ;;  %v2322_v45 = vsel %vm995_vm5, %v2211_v18, %v2321_v52  ;;  %v1862_v7 = vadd.f32 %v1861_v55, %v1860_v31  ;;  %v1876_v24 = vadd.f32 %v1875_v51, %v1874_v26  ;;  %v1869_v23 = vadd.f32 %v1868_v0, %v1867_v20  ;;  %v3616_v55 = vld [vmem:[%s3786_s1 + $0x60] sm:$0xff]   ;;  %v3630_v26 = vld [vmem:[%s3786_s1 + $0x70] sm:$0xff]  }
 0x420   :  { %v2215_v59 = vrot.slane %v1698_v15, %v3496_v33  ;;  %v2219_v30 = vrot.slane %v1703_v3, %v3493_v54  ;;  %v1637_v34 = vunpack.c.l.bf16 %v3569_v62  ;;  %v1638_v47 = vunpack.c.h.bf16 %v3569_v62 }
 0x421   :  { %v1863_v28 = vrot.slane %v1862_v7, 1  ;;  %v1823_v52 = vmul.f32 %v1698_v15, %v1631_v42  ;;  %v1824_v13 = vmul.f32 %v1703_v3, %v1632_v9  ;;  %v1639_v14 = vunpack.c.l.bf16 %v2705_v17  ;;  %v3587_v15 = vld [vmem:[%s3786_s1 + $0x48] sm:$0xff]  }
 0x422   :  { %v2220_v61 = vsel %vm2183_vm11, %v2219_v30, %v2215_v59  ;;  %v1640_v37 = vunpack.c.h.bf16 %v2705_v17  ;;  %v1877_v58 = vrot.slane %v1876_v24, 4  ;;  %v1641_v43 = vunpack.c.l.bf16 %v3587_v15  ;;  %v3594_v59 = vld [vmem:[%s3786_s1 + $0x50] sm:$0xff]  }
 0x423   :  { %v3533_v44 = vpop.permute.xlu1 %1707  ;;  %v3535_v19 = vpop.permute.xlu0 %1712  ;;  %v2323_v39 = vsel %vm997_vm6, %v2220_v61, %v2322_v45  ;;  %v1642_v3 = vunpack.c.h.bf16 %v3587_v15  ;;  %v1855_v45 = vadd.f32 %v1854_v32, %v1853_v48  ;;  %v1643_v25 = vunpack.c.l.bf16 %v3594_v59 }
 0x424   :  { %v2224_v60 = vrot.slane %v3533_v44, %v3496_v33  ;;  %v2228_v10 = vrot.slane %v3535_v19, %v3493_v54  ;;  %v1644_v12 = vunpack.c.h.bf16 %v3594_v59  ;;  %v1645_v31 = vunpack.c.l.bf16 %v3601_v2 }
 0x425   :  { %v1864_v41 = vadd.f32 %v1863_v28, %v1862_v7  ;;  %v1870_v4 = vrot.slane %v1869_v23, 2  ;;  %v1883_v30 = vsel %vm82_vm1, %v1823_v52, 0.0  ;;  %v1884_v61 = vsel %vm82_vm1, %v1824_v13, 0.0 }
 0x426   :  { %v2229_v16 = vsel %vm2183_vm11, %v2228_v10, %v2224_v60  ;;  %v1825_v60 = vmul.f32 %v3533_v44, %v1633_v11  ;;  %v1826_v20 = vmul.f32 %v3535_v19, %v1634_v22  ;;  %v1878_v5 = vadd.f32 %v1877_v58, %v1876_v24  ;;  %v3623_v44 = vld [vmem:[%s3786_s1 + $0x68] sm:$0xff]  }
 0x427   :  { %v3543_v53 = vpop.permute.xlu1 %1717  ;;  %v3545_v27 = vpop.permute.xlu0 %1722  ;;  %v2324_v56 = vsel %vm999_vm7, %v2229_v16, %v2323_v39  ;;  %v1646_v39 = vunpack.c.h.bf16 %v3601_v2  ;;  %v1647_v10 = vunpack.c.l.bf16 %v3616_v55  ;;  %v1648_v16 = vunpack.c.h.bf16 %v3616_v55 }
 0x428   :  { %v2233_v36 = vrot.slane %v3543_v53, %v3496_v33  ;;  %v2237_v29 = vrot.slane %v3545_v27, %v3493_v54  ;;  %v1991_v48 = vpack.c.bf16 %v1855_v45, %v1855_v45  ;;  %v1649_v19 = vunpack.c.l.bf16 %v3623_v44 }
 0x429   :  { %v1650_v0 = vunpack.c.h.bf16 %v3623_v44  ;;  %v1651_v51 = vunpack.c.l.bf16 %v3630_v26  ;;  %v1992_v46 = vpack.c.bf16 %v1864_v41, %v1864_v41  ;;  %v1871_v42 = vadd.f32 %v1870_v4, %v1869_v23  ;;  %v3642_v23 = vld [vmem:[%s3786_s1 + $0x78] sm:$0xff]  }
 0x42a   :  { %v2238_v6 = vsel %vm2183_vm11, %v2237_v29, %v2233_v36  ;;  %v1885_v7 = vadd.f32 %v1884_v61, %v1883_v30  ;;  %v1892_v36 = vsel %vm82_vm1, %v1825_v60, 0.0  ;;  %v1893_v9 = vsel %vm82_vm1, %v1826_v20, 0.0 }
 0x42b   :  { %v3559_v63 = vpop.permute.xlu1 %1727  ;;  %v3573_v1 = vpop.permute.xlu0 %1732  ;;  %v2325_v57 = vsel %vm1001_vm8, %v2238_v6, %v2324_v56  ;;  %v1652_v56 = vunpack.c.h.bf16 %v3630_v26  ;;  %v1827_v50 = vmul.f32 %v3543_v53, %v1635_v21  ;;  %v1828_v11 = vmul.f32 %v3545_v27, %v1636_v35 }
 0x42c   :  { %v2242_v49 = vrot.slane %v3559_v63, %v3496_v33  ;;  %v2246_v18 = vrot.slane %v3573_v1, %v3493_v54  ;;  %v1879_v40 = vrot.slane %v1878_v5, 2  ;;  %v1653_v28 = vunpack.c.l.bf16 %v3642_v23 }
 0x42d   :  { %v3645_v52 = vunpack.c.l.b16 %v1991_v48  ;;  %v1654_v27 = vunpack.c.h.bf16 %v3642_v23  ;;  %v3649_v21 = vunpack.c.l.b16 %v1992_v46  ;;  %v1872_v35 = vrot.slane %v1871_v42, 1 }
 0x42e   :  { %v2247_v38 = vsel %vm2183_vm11, %v2246_v18, %v2242_v49  ;;  %v1886_v49 = vrot.slane %v1885_v7, 4  ;;  %v1894_v13 = vadd.f32 %v1893_v9, %v1892_v36  ;;  %v1902_v17 = vsel %vm82_vm1, %v1828_v11, 0.0 }
 0x42f   :  { %v3610_v8 = vsel %vm1003_vm9, %v2247_v38, %v2325_v57  ;;  %v1901_v57 = vsel %vm82_vm1, %v1827_v50, 0.0  ;;  %v1880_v15 = vadd.f32 %v1879_v40, %v1878_v5  ;;  %v1830_v45 = vmul.f32 %v3573_v1, %v1638_v47 }
 0x430   :  { %v1903_v20 = vadd.f32 %v1902_v17, %v1901_v57  ;;  %v3665_v5 = vadd.f32 %v1872_v35, %v1871_v42 }
 0x431   :  { %v1911_v36 = vsel %vm82_vm1, %v1830_v45, 0.0 }
 0x437   :  { %v1738_v22 = vpop.permute.xlu1 %1737  ;;  %v1743_v24 = vpop.permute.xlu0 %1742 }
 0x438   :  { %v1831_v29 = vmul.f32 %v1738_v22, %v1639_v14  ;;  %v2251_v32 = vrot.slane %v1738_v22, %v3496_v33  ;;  %v1832_v6 = vmul.f32 %v1743_v24, %v1640_v37  ;;  %v2255_v53 = vrot.slane %v1743_v24, %v3493_v54 }
 0x439   :  { %v1829_v14 = vmul.f32 %v3559_v63, %v1637_v34  ;;  %v1887_v63 = vadd.f32 %v1886_v49, %v1885_v7  ;;  %v1895_v34 = vrot.slane %v1894_v13, 4  ;;  %v1881_v24 = vrot.slane %v1880_v15, 1 }
 0x43a   :  { %v2256_v58 = vsel %vm2183_vm11, %v2255_v53, %v2251_v32  ;;  %v1919_v41 = vsel %vm82_vm1, %v1831_v29, 0.0  ;;  %v1920_v30 = vsel %vm82_vm1, %v1832_v6, 0.0  ;;  %v1904_v32 = vrot.slane %v1903_v20, 4 }
 0x43b   :  { %v1748_v37 = vpop.permute.xlu1 %1747  ;;  %v1753_v18 = vpop.permute.xlu0 %1752  ;;  %v1910_v62 = vsel %vm82_vm1, %v1829_v14, 0.0  ;;  %v1888_v40 = vrot.slane %v1887_v63, 2  ;;  %v1896_v29 = vadd.f32 %v1895_v34, %v1894_v13  ;;  %v3688_v45 = vadd.f32 %v1881_v24, %v1880_v15 }
 0x43c   :  { %v1833_v4 = vmul.f32 %v1748_v37, %v1641_v43  ;;  %v2260_v38 = vrot.slane %v1748_v37, %v3496_v33  ;;  %v1834_v61 = vmul.f32 %v1753_v18, %v1642_v3  ;;  %v2264_v60 = vrot.slane %v1753_v18, %v3493_v54 }
 0x43d   :  { %v1921_v3 = vadd.f32 %v1920_v30, %v1919_v41  ;;  %v1912_v6 = vadd.f32 %v1911_v36, %v1910_v62  ;;  %v3690_v41 = vadd.f32 %v1888_v40, %v1887_v63 }
 0x43e   :  { %v1928_v48 = vsel %vm82_vm1, %v1833_v4, 0.0  ;;  %v1929_v47 = vsel %vm82_vm1, %v1834_v61, 0.0  ;;  %v2265_v1 = vsel %vm2183_vm11, %v2264_v60, %v2260_v38  ;;  %v1897_v4 = vrot.slane %v1896_v29, 2 }
 0x43f   :  { %v1758_v43 = vpop.permute.xlu1 %1757  ;;  %v1763_v46 = vpop.permute.xlu0 %1762  ;;  %v1930_v9 = vadd.f32 %v1929_v47, %v1928_v48  ;;  %v2327_v7 = vsel %vm991_vm3, %v2265_v1, %v2256_v58  ;;  %v1922_v17 = vrot.slane %v1921_v3, 4  ;;  %v1905_v38 = vadd.f32 %v1904_v32, %v1903_v20 }
 0x440   :  { %v1835_v50 = vmul.f32 %v1758_v43, %v1643_v25  ;;  %v2269_v42 = vrot.slane %v1758_v43, %v3496_v33  ;;  %v1836_v11 = vmul.f32 %v1763_v46, %v1644_v12  ;;  %v2273_v22 = vrot.slane %v1763_v46, %v3493_v54 }
 0x441   :  { %v1931_v14 = vrot.slane %v1930_v9, 4  ;;  %v1913_v62 = vrot.slane %v1912_v6, 4  ;;  %v1923_v2 = vadd.f32 %v1922_v17, %v1921_v3  ;;  %v1890_v43 = vrot.slane %v3690_v41, 1 }
 0x442   :  { %v1937_v53 = vsel %vm82_vm1, %v1835_v50, 0.0  ;;  %v1938_v35 = vsel %vm82_vm1, %v1836_v11, 0.0  ;;  %v2274_v49 = vsel %vm2183_vm11, %v2273_v22, %v2269_v42  ;;  %v3702_v46 = vadd.f32 %v1897_v4, %v1896_v29 }
 0x443   :  { %v1768_v57 = vpop.permute.xlu1 %1767  ;;  %v1773_v25 = vpop.permute.xlu0 %1772  ;;  %v1939_v58 = vadd.f32 %v1938_v35, %v1937_v53  ;;  %v2328_v59 = vsel %vm993_vm4, %v2274_v49, %v2327_v7  ;;  %v1906_v50 = vrot.slane %v1905_v38, 2  ;;  %v1914_v22 = vadd.f32 %v1913_v62, %v1912_v6 }
 0x444   :  { %v1837_v12 = vmul.f32 %v1768_v57, %v1645_v31  ;;  %v2278_v13 = vrot.slane %v1768_v57, %v3496_v33  ;;  %v1838_v37 = vmul.f32 %v1773_v25, %v1646_v39  ;;  %v2282_v18 = vrot.slane %v1773_v25, %v3493_v54 }
 0x445   :  { %v1940_v30 = vrot.slane %v1939_v58, 4  ;;  %v1932_v39 = vadd.f32 %v1931_v14, %v1930_v9  ;;  %v1924_v24 = vrot.slane %v1923_v2, 2  ;;  %v1899_v35 = vrot.slane %v3702_v46, 1 }
 0x446   :  { %v1946_v61 = vsel %vm82_vm1, %v1837_v12, 0.0  ;;  %v1947_v60 = vsel %vm82_vm1, %v1838_v37, 0.0  ;;  %v2283_v31 = vsel %vm2183_vm11, %v2282_v18, %v2278_v13  ;;  %v3717_v13 = vadd.f32 %v1906_v50, %v1905_v38 }
 0x447   :  { %v1778_v34 = vpop.permute.xlu1 %1777  ;;  %v1783_v48 = vpop.permute.xlu0 %1782  ;;  %v1948_v47 = vadd.f32 %v1947_v60, %v1946_v61  ;;  %v2329_v15 = vsel %vm995_vm5, %v2283_v31, %v2328_v59  ;;  %v1941_v36 = vadd.f32 %v1940_v30, %v1939_v58  ;;  %v1933_v40 = vrot.slane %v1932_v39, 2 }
 0x448   :  { %v1839_v63 = vmul.f32 %v1778_v34, %v1647_v10  ;;  %v2287_v1 = vrot.slane %v1778_v34, %v3496_v33  ;;  %v1840_v20 = vmul.f32 %v1783_v48, %v1648_v16  ;;  %v2291_v42 = vrot.slane %v1783_v48, %v3493_v54 }
 0x449   :  { %v1949_v7 = vrot.slane %v1948_v47, 4  ;;  %v1942_v49 = vrot.slane %v1941_v36, 2  ;;  %v1925_v37 = vadd.f32 %v1924_v24, %v1923_v2  ;;  %v1934_v4 = vadd.f32 %v1933_v40, %v1932_v39 }
 0x44a   :  { %v1955_v3 = vsel %vm82_vm1, %v1839_v63, 0.0  ;;  %v1956_v9 = vsel %vm82_vm1, %v1840_v20, 0.0  ;;  %v2292_v32 = vsel %vm2183_vm11, %v2291_v42, %v2287_v1  ;;  %v1908_v24 = vrot.slane %v3717_v13, 1 }
 0x44b   :  { %v1788_v11 = vpop.permute.xlu1 %1787  ;;  %v1793_v10 = vpop.permute.xlu0 %1792  ;;  %v1950_v55 = vadd.f32 %v1949_v7, %v1948_v47  ;;  %v1957_v16 = vadd.f32 %v1956_v9, %v1955_v3  ;;  %v2330_v25 = vsel %vm997_vm6, %v2292_v32, %v2329_v15  ;;  %v1943_v31 = vadd.f32 %v1942_v49, %v1941_v36 }
 0x44c   :  { %v1841_v29 = vmul.f32 %v1788_v11, %v1649_v19  ;;  %v2296_v53 = vrot.slane %v1788_v11, %v3496_v33  ;;  %v1842_v14 = vmul.f32 %v1793_v10, %v1650_v0  ;;  %v2300_v58 = vrot.slane %v1793_v10, %v3493_v54 }
 0x44d   :  { %v1951_v57 = vrot.slane %v1950_v55, 2  ;;  %v1958_v17 = vrot.slane %v1957_v16, 4  ;;  %v1915_v19 = vrot.slane %v1914_v22, 2  ;;  %v1926_v47 = vrot.slane %v1925_v37, 1 }
 0x44e   :  { %v1964_v6 = vsel %vm82_vm1, %v1841_v29, 0.0  ;;  %v1965_v61 = vsel %vm82_vm1, %v1842_v14, 0.0  ;;  %v2301_v60 = vsel %vm2183_vm11, %v2300_v58, %v2296_v53  ;;  %v1935_v20 = vrot.slane %v1934_v4, 1 }
 0x44f   :  { %v1798_v59 = vpop.permute.xlu1 %1797  ;;  %v1803_v12 = vpop.permute.xlu0 %1802  ;;  %v1959_v30 = vadd.f32 %v1958_v17, %v1957_v16  ;;  %v1952_v44 = vadd.f32 %v1951_v57, %v1950_v55  ;;  %v1966_v0 = vadd.f32 %v1965_v61, %v1964_v6  ;;  %v2331_v38 = vsel %vm999_vm7, %v2301_v60, %v2330_v25 }
 0x450   :  { %v1843_v18 = vmul.f32 %v1798_v59, %v1651_v51  ;;  %v2305_v34 = vrot.slane %v1798_v59, %v3496_v33  ;;  %v1844_v2 = vmul.f32 %v1803_v12, %v1652_v56  ;;  %v1916_v39 = vadd.f32 %v1915_v19, %v1914_v22 }
 0x451   :  { %v1960_v48 = vrot.slane %v1959_v30, 2  ;;  %v1967_v15 = vrot.slane %v1966_v0, 4  ;;  %v2309_v63 = vrot.slane %v1803_v12, %v3493_v54  ;;  %v1944_v3 = vrot.slane %v1943_v31, 1 }
 0x452   :  { %v1973_v62 = vsel %vm82_vm1, %v1843_v18, 0.0  ;;  %v1974_v7 = vsel %vm82_vm1, %v1844_v2, 0.0  ;;  %v1953_v9 = vrot.slane %v1952_v44, 1  ;;  %v1936_v49 = vadd.f32 %v1935_v20, %v1934_v4 }
 0x453   :  { %v1808_v51 = vpop.permute.xlu1 %1807  ;;  %v1813_v1 = vpop.permute.xlu0 %1812  ;;  %v1961_v36 = vadd.f32 %v1960_v48, %v1959_v30  ;;  %v1968_v42 = vadd.f32 %v1967_v15, %v1966_v0  ;;  %v1975_v11 = vadd.f32 %v1974_v7, %v1973_v62  ;;  %v2310_v26 = vsel %vm2183_vm11, %v2309_v63, %v2305_v34 }
 0x454   :  { %v1845_v50 = vmul.f32 %v1808_v51, %v1653_v28  ;;  %v2314_v10 = vrot.slane %v1808_v51, %v3496_v33  ;;  %v1846_v22 = vmul.f32 %v1813_v1, %v1654_v27  ;;  %v2332_v16 = vsel %vm1001_vm8, %v2310_v26, %v2331_v38 }
 0x455   :  { %v1969_v40 = vrot.slane %v1968_v42, 2  ;;  %v1976_v55 = vrot.slane %v1975_v11, 4  ;;  %v1917_v28 = vrot.slane %v1916_v39, 1  ;;  %v1962_v32 = vrot.slane %v1961_v36, 1 }
 0x456   :  { %v1982_v56 = vsel %vm82_vm1, %v1845_v50, 0.0  ;;  %v1983_v29 = vsel %vm82_vm1, %v1846_v22, 0.0  ;;  %v2318_v53 = vrot.slane %v1813_v1, %v3493_v54  ;;  %v1927_v33 = vadd.f32 %v1926_v47, %v1925_v37 }
 0x457   :  { %v1970_v57 = vadd.f32 %v1969_v40, %v1968_v42  ;;  %v1977_v25 = vadd.f32 %v1976_v55, %v1975_v11  ;;  %v1984_v17 = vadd.f32 %v1983_v29, %v1982_v56  ;;  %v1945_v6 = vadd.f32 %v1944_v3, %v1943_v31 }
 0x458   :  { %v1954_v23 = vadd.f32 %v1953_v9, %v1952_v44  ;;  %v2319_v27 = vsel %vm2183_vm11, %v2318_v53, %v2314_v10  ;;  %v1993_v19 = vpack.c.bf16 %v3665_v5, %v3665_v5  ;;  %v1891_v54 = vadd.f32 %v1890_v43, %v3690_v41 }
 0x459   :  { %v1971_v14 = vrot.slane %v1970_v57, 1  ;;  %v1978_v58 = vrot.slane %v1977_v25, 2  ;;  %v1985_v59 = vrot.slane %v1984_v17, 4  ;;  %v3743_v12 = vsel %vm1003_vm9, %v2319_v27, %v2332_v16 }
 0x45a   :  { %v1900_v37 = vadd.f32 %v1899_v35, %v3702_v46  ;;  %v1963_v18 = vadd.f32 %v1962_v32, %v1961_v36  ;;  %v2000_v4 = vpack.c.bf16 %v1936_v49, %v1936_v49  ;;  %v1994_v31 = vpack.c.bf16 %v3688_v45, %v3688_v45 }
 0x45b   :  { %v1972_v30 = vadd.f32 %v1971_v14, %v1970_v57  ;;  %v1979_v61 = vadd.f32 %v1978_v58, %v1977_v25  ;;  %v1986_v60 = vadd.f32 %v1985_v59, %v1984_v17  ;;  %v1909_v44 = vadd.f32 %v1908_v24, %v3717_v13 }
 0x45c   :  { %v1918_v0 = vadd.f32 %v1917_v28, %v1916_v39  ;;  %v2001_v5 = vpack.c.bf16 %v1945_v6, %v1945_v6  ;;  %v1999_v34 = vpack.c.bf16 %v1927_v33, %v1927_v33  ;;  %v2002_v48 = vpack.c.bf16 %v1954_v23, %v1954_v23 }
 0x45d   :  { %v1980_v38 = vrot.slane %v1979_v61, 1  ;;  %v1987_v41 = vrot.slane %v1986_v60, 2  ;;  %v2086_v43 = vunpack.c.l.b16 %v1993_v19  ;;  %v1995_v62 = vpack.c.bf16 %v1891_v54, %v1891_v54 }
 0x45e   :  { %v1996_v2 = vpack.c.bf16 %v1900_v37, %v1900_v37  ;;  %v2003_v46 = vpack.c.bf16 %v1963_v18, %v1963_v18  ;;  %v2093_v35 = vunpack.c.l.b16 %v2000_v4  ;;  %v2004_v51 = vpack.c.bf16 %v1972_v30, %v1972_v30 }
 0x45f   :  { %v1981_v47 = vadd.f32 %v1980_v38, %v1979_v61  ;;  %v1988_v15 = vadd.f32 %v1987_v41, %v1986_v60  ;;  %v2087_v63 = vunpack.c.l.b16 %v1994_v31  ;;  %v1997_v1 = vpack.c.bf16 %v1909_v44, %v1909_v44 }
 0x460   :  { %v1998_v20 = vpack.c.bf16 %v1918_v0, %v1918_v0  ;;  %v2094_v45 = vunpack.c.l.b16 %v2001_v5  ;;  %v2092_v36 = vunpack.c.l.b16 %v1999_v34  ;;  %v2095_v13 = vunpack.c.l.b16 %v2002_v48 }
 0x461   :  { %v2005_v39 = vpack.c.bf16 %v1981_v47, %v1981_v47  ;;  %v1989_v7 = vrot.slane %v1988_v15, 1  ;;  %v2100_v50 = vsel %vm991_vm3, %v3649_v21, %v3645_v52  ;;  %v2088_v3 = vunpack.c.l.b16 %v1995_v62 }
 0x462   :  { %v2096_v9 = vunpack.c.l.b16 %v2003_v46  ;;  %v2089_v42 = vunpack.c.l.b16 %v1996_v2  ;;  %v2107_v11 = vsel %vm991_vm3, %v2093_v35, %v2092_v36  ;;  %v2097_v26 = vunpack.c.l.b16 %v2004_v51 }
 0x463   :  { %v1990_v56 = vadd.f32 %v1989_v7, %v1988_v15  ;;  %v2101_v10 = vsel %vm993_vm4, %v2086_v43, %v2100_v50  ;;  %v2090_v22 = vunpack.c.l.b16 %v1997_v1  ;;  %v2108_v24 = vsel %vm993_vm4, %v2094_v45, %v2107_v11 }
 0x464   :  { %v2098_v40 = vunpack.c.l.b16 %v2005_v39  ;;  %v2102_v55 = vsel %vm995_vm5, %v2087_v63, %v2101_v10  ;;  %v2091_v16 = vunpack.c.l.b16 %v1998_v20  ;;  %v2109_v28 = vsel %vm995_vm5, %v2095_v13, %v2108_v24 }
 0x465   :  { %v2006_v32 = vpack.c.bf16 %v1990_v56, %v1990_v56  ;;  %v2103_v52 = vsel %vm997_vm6, %v2088_v3, %v2102_v55  ;;  %v2110_v21 = vsel %vm997_vm6, %v2096_v9, %v2109_v28 }
 0x466   :  { %v2104_v29 = vsel %vm999_vm7, %v2089_v42, %v2103_v52  ;;  %v2111_v53 = vsel %vm999_vm7, %v2097_v26, %v2110_v21 }
 0x467   :  { %v2099_v49 = vunpack.c.l.b16 %v2006_v32  ;;  %v2105_v57 = vsel %vm1001_vm8, %v2090_v22, %v2104_v29  ;;  %v2112_v25 = vsel %vm1001_vm8, %v2098_v40, %v2111_v53 }
 0x468   :  { %v2106_v17 = vsel %vm1003_vm9, %v2091_v16, %v2105_v57 }
 0x469   :  { %v2113_v33 = vsel %vm1003_vm9, %v2099_v49, %v2112_v25 }
 0x46a   :  { %v2114_v6 = vpack.c.b16 %v2113_v33, %v2106_v17 }
 0x46c   :  { %2474 = vmatmul.mubr.msk.bf16.vlgmr.msra.gmra.mrb[12].mxu0 %vm82_vm1, %v2114_v6 }
 0x53f   :  { %v2164_v23 = vpop.f32.mrb[12].mxu0 }
 0x540   :  { %2692 = vtanh.f32 %v2164_v23  ;;  %v2475_v27 = vpop.f32.mrb[13].mxu0 }
 0x541   :  { %v2167_v14 = vpop.f32.mrb[14].mxu0 }
 0x542   :  { %2694 = vtanh.f32 %v2167_v14  ;;  %v2476_v58 = vpop.f32.mrb[15].mxu0 }
 0x54a   :  { %v2693_v59 = vpop.eup %2692 }
 0x54b   :  { %v2336_v19 = vsel %vm82_vm1, %v2693_v59, %v3610_v8 }
 0x54c   :  { %v2695_v54 = vpop.eup %2694  ;;  %2339 = vst.msk [vmem:[%s3790_s7] sm:$0xff] %vm2338_vm12, %v2336_v19 }
 0x54d   :  { %v2337_v37 = vsel %vm82_vm1, %v2695_v54, %v3743_v12 }
 0x54e   :  { %2340 = vst.msk [vmem:[%s3790_s7 + $0x8] sm:$0xff] %vm2338_vm12, %v2337_v37 }

</bundles_post_ra>
